<compile_context>
chip_gen: v5e
topology: v5e:2x2
jax: 0.10.0
libtpu: 0.0.40
codegen_flags: <defaults>
</compile_context>

<pallas_src>
import functools

import jax
import jax.numpy as jnp
from jax.experimental import pallas as pl
from jax.experimental.pallas import tpu as pltpu


def _pick_block_batch(batch):
    """Samples per grid step.

    >=2 grid steps whenever batch >= 2 (so v7x's two TensorCores both get
    work), capped at 4 so double-buffered patch blocks + resident weights fit
    v5e's 16 MiB default scoped VMEM.
    """
    if batch >= 8:
        return 4
    if batch >= 4:
        return 2
    return 1


# ----------------------------------------------------------------------------
# Fused per-step kernel: conv1 -> relu -> conv2 -> relu -> fc1 -> relu -> fc2
# for a block of `bt` samples.
# ----------------------------------------------------------------------------
def _qnet_kernel(p_ref, w1_ref, b1_ref, w2_ref, b2_ref,
                 wf1_ref, bf1_ref, wf2_ref, bf2_ref, o_ref, *, bt):
    f32 = jnp.float32

    # conv1 for all bt samples of this step as ONE wide matmul:
    # (64, 1152) x (1152, bt*128) -> (64, bt*128), f32 accumulation.
    s_all = jnp.dot(w1_ref[...], p_ref[0], preferred_element_type=f32)

    # Lanes >= 100 of each 128-lane sample block are im2col zero padding;
    # zero them explicitly after bias+ReLU so no junk leaks downstream.
    lane = jax.lax.broadcasted_iota(jnp.int32, (64, 128), 1)
    valid = lane < 100

    b1 = b1_ref[...]                                   # (64, 128) pre-broadcast
    b2 = b2_ref[...]                                   # (16, 90)  pre-broadcast
    bf1 = bf1_ref[...]                                 # (1, 256)

    hs = []
    for t in range(bt):                                # unrolled, independent work
        s = s_all[:, t * 128:(t + 1) * 128] + b1       # 128-aligned lane slice
        s = jnp.where(valid, jnp.maximum(s, 0.0), 0.0)

        # conv2 (+ReLU): k=8,s=4 over 40x40 == k=2,s=1 over the 10x10 block
        # grid -> 4 accumulated quadrant matmuls ("acc += dot", MRB-friendly).
        a2 = jnp.dot(w2_ref[0], s[:, 0:90], preferred_element_type=f32)
        a2 = a2 + jnp.dot(w2_ref[1], s[:, 1:91], preferred_element_type=f32)
        a2 = a2 + jnp.dot(w2_ref[2], s[:, 10:100], preferred_element_type=f32)
        a2 = a2 + jnp.dot(w2_ref[3], s[:, 11:101], preferred_element_type=f32)
        a2 = jnp.maximum(a2 + b2, 0.0)                 # (16, 90); cols%10==9 are
        # junk positions and are multiplied by zero rows of the fc1 weight.

        # fc1 (+ReLU): 4 channel-stacked (4,90)x(90,1024) matmuls summed into
        # one (4,1024) partial; per-channel (1,256) blocks come off its
        # diagonal with 256-aligned lane slices and a small add tree (no
        # 16-long dependent narrow add chain).
        f = jnp.dot(a2[0:4, :], wf1_ref[0], preferred_element_type=f32)
        f = f + jnp.dot(a2[4:8, :], wf1_ref[1], preferred_element_type=f32)
        f = f + jnp.dot(a2[8:12, :], wf1_ref[2], preferred_element_type=f32)
        f = f + jnp.dot(a2[12:16, :], wf1_ref[3], preferred_element_type=f32)
        h = (bf1 + f[0:1, 0:256] + f[1:2, 256:512]) + \
            (f[2:3, 512:768] + f[3:4, 768:1024])
        hs.append(jnp.maximum(h, 0.0))

    # fc2, batched across the bt samples of this step: (bt,256) x (256,128).
    hmat = hs[0] if bt == 1 else jnp.concatenate(hs, axis=0)
    out = jnp.dot(hmat, wf2_ref[...], preferred_element_type=f32)
    o_ref[0] = out + bf2_ref[...]


def _fused_forward(pre, patches, bt):
    nsteps, _, lanes = patches.shape
    c2 = lambda b: (0, 0)
    c3 = lambda b: (0, 0, 0)
    out = pl.pallas_call(
        functools.partial(_qnet_kernel, bt=bt),
        out_shape=jax.ShapeDtypeStruct((nsteps, bt, 128), jnp.float32),
        grid=(nsteps,),
        in_specs=[
            pl.BlockSpec((1, 1152, lanes), lambda b: (b, 0, 0)),  # patches (bf16)
            pl.BlockSpec((64, 1152), c2),     # conv1 block-diag^T (bf16)
            pl.BlockSpec((64, 128), c2),      # conv1 bias, pre-broadcast
            pl.BlockSpec((4, 16, 64), c3),    # conv2 quadrant weights
            pl.BlockSpec((16, 90), c2),       # conv2 bias, pre-broadcast
            pl.BlockSpec((4, 90, 1024), c3),  # fc1 channel-stacked weight
            pl.BlockSpec((1, 256), c2),       # fc1 bias
            pl.BlockSpec((256, 128), c2),     # fc2 weight (padded to 128 lanes)
            pl.BlockSpec((1, 128), c2),       # fc2 bias (padded)
        ],
        out_specs=pl.BlockSpec((1, bt, 128), lambda b: (b, 0, 0)),
        compiler_params=pltpu.CompilerParams(
            dimension_semantics=("parallel",)),
    )(patches, pre["w1"], pre["b1"], pre["w2"], pre["b2"],
      pre["wf1"], pre["bf1"], pre["wf2"], pre["bf2"])
    return out.reshape(nsteps * bt, 128)


# ----------------------------------------------------------------------------
# Wrapper glue: conv1 im2col emitted directly in the kernel's s2d layout,
# packed bt samples per grid step, cast to bf16.
# ----------------------------------------------------------------------------
def _build_conv1_patches(x, bt):
    """(B, 2, 84, 84) -> (cdiv(B,bt), 1152, bt*128) bf16.

    For sample lanes [t*128, t*128+100): row = (ry*4+rx)*72 + (c*36+ky*6+kx),
    col = by*10 + bx where conv1 output position is (4*by+ry, 4*bx+rx).
    Lanes [t*128+100, t*128+128) are zero padding.
    """
    B = x.shape[0]
    nsteps = -(-B // bt)
    Bp = nsteps * bt
    if Bp != B:
        x = jnp.pad(x, ((0, Bp - B), (0, 0), (0, 0), (0, 0)))
    x = x.astype(jnp.bfloat16)

    cols = []
    for ky in range(6):
        for kx in range(6):
            cols.append(x[:, :, ky:ky + 79:2, kx:kx + 79:2])   # (Bp, 2, 40, 40)
    p = jnp.stack(cols, axis=2)                 # (Bp, 2, 36, 40, 40)
    p = p.reshape(Bp, 72, 10, 4, 10, 4)         # (Bp, k, by, ry, bx, rx)
    p = p.transpose(0, 3, 5, 1, 2, 4)           # (Bp, ry, rx, k, by, bx)
    p = p.reshape(Bp, 1152, 100)
    p = jnp.pad(p, ((0, 0), (0, 0), (0, 28)))   # (Bp, 1152, 128)
    p = p.reshape(nsteps, bt, 1152, 128).transpose(0, 2, 1, 3)
    return p.reshape(nsteps, 1152, bt * 128)


# ----------------------------------------------------------------------------
# One-time parameter preprocessing (hoisted out of the jitted hot path).
# Canonical params keep the PyTorch layout (OIHW convs, fc stored (in, out)
# with the "in" index ordered channel-major like .view(-1, 16*9*9)).
# ----------------------------------------------------------------------------
def preprocess_params(params, action_size):
    f32 = jnp.float32

    # conv1 -> transposed block-diagonal weight (64, 1152), bf16.
    w1m = params["conv1_w"].astype(f32).reshape(4, 72).T          # (72, 4)
    w1 = jnp.kron(jnp.eye(16, dtype=f32), w1m).T                  # (64, 1152)
    w1 = w1.astype(jnp.bfloat16)
    b1 = jnp.tile(jnp.tile(params["conv1_b"].astype(f32), 16)[:, None],
                  (1, 128))                                       # (64, 128)

    # conv2 -> 4 quadrant matrices: [q][c_out, (ry*4+rx)*4 + c_in]
    cw2 = params["conv2_w"].astype(f32)                           # (16, 4, 8, 8)
    quads = []
    for qy in range(2):
        for qx in range(2):
            sub = cw2[:, :, qy * 4:(qy + 1) * 4, qx * 4:(qx + 1) * 4]
            quads.append(jnp.transpose(sub, (0, 2, 3, 1)).reshape(16, 64))
    w2 = jnp.stack(quads, axis=0)                                 # (4, 16, 64)
    b2 = jnp.tile(params["conv2_b"].astype(f32)[:, None], (1, 90))  # (16, 90)

    # fc1 -> absorb PyTorch's channel-major flatten, pad ox 9->10 (junk rows
    # zeroed), stack channels along N in groups of 4: (4, 90, 1024).
    wf1 = params["fc1_w"].astype(f32).reshape(16, 9, 9, 256)      # [c, oy, ox, n]
    wf1 = jnp.pad(wf1, ((0, 0), (0, 0), (0, 1), (0, 0)))          # (16, 9, 10, 256)
    wf1 = wf1.reshape(4, 4, 90, 256).transpose(0, 2, 1, 3).reshape(4, 90, 1024)
    bf1 = params["fc1_b"].astype(f32).reshape(1, 256)

    # fc2 -> pad the output dimension to 128 lanes (lane-dense store).
    wf2 = jnp.zeros((256, 128), f32).at[:, :action_size].set(
        params["fc2_w"].astype(f32))
    bf2 = jnp.zeros((1, 128), f32).at[0, :action_size].set(
        params["fc2_b"].astype(f32))

    return {"w1": w1, "b1": b1, "w2": w2, "b2": b2,
            "wf1": wf1, "bf1": bf1, "wf2": wf2, "bf2": bf2}


# ----------------------------------------------------------------------------
# Parameters (deterministic PyTorch-default-style uniform init).
# ----------------------------------------------------------------------------
def init_qnetwork_params(key, action_size):
    lsize = 16 * 9 * 9

    def uni(k, shape, fan_in):
        bound = 1.0 / jnp.sqrt(jnp.float32(fan_in))
        return jax.random.uniform(k, shape, jnp.float32, -bound, bound)

    ks = jax.random.split(key, 8)
    return {
        "conv1_w": uni(ks[0], (4, 2, 6, 6), 2 * 6 * 6),
        "conv1_b": uni(ks[1], (4,), 2 * 6 * 6),
        "conv2_w": uni(ks[2], (16, 4, 8, 8), 4 * 8 * 8),
        "conv2_b": uni(ks[3], (16,), 4 * 8 * 8),
        "fc1_w": uni(ks[4], (lsize, 256), lsize),   # stored (in, out)
        "fc1_b": uni(ks[5], (256,), lsize),
        "fc2_w": uni(ks[6], (256, action_size), 256),
        "fc2_b": uni(ks[7], (action_size,), 256),
    }


# ----------------------------------------------------------------------------
# Forward pass: state (B, 2, 84, 84) -> action values (B, action_size)
# ----------------------------------------------------------------------------
@functools.partial(jax.jit, static_argnames=("action_size", "block_batch"))
def qnetwork_forward(pre, x, *, action_size, block_batch=None):
    B = x.shape[0]
    bt = block_batch if block_batch is not None else _pick_block_batch(B)
    patches = _build_conv1_patches(x, bt)
    out = _fused_forward(pre, patches, bt)
    return out[:B, :action_size]


# Pure-JAX/XLA reference (mirrors the PyTorch module) used to validate.
def reference_forward(params, x):
    y = jax.lax.conv_general_dilated(
        x, params["conv1_w"], window_strides=(2, 2), padding="VALID",
        dimension_numbers=("NCHW", "OIHW", "NCHW"))
    y = jax.nn.relu(y + params["conv1_b"][None, :, None, None])
    y = jax.lax.conv_general_dilated(
        y, params["conv2_w"], window_strides=(4, 4), padding="VALID",
        dimension_numbers=("NCHW", "OIHW", "NCHW"))
    y = jax.nn.relu(y + params["conv2_b"][None, :, None, None])
    y = y.reshape(y.shape[0], -1)                    # channel-major flatten
    y = jax.nn.relu(y @ params["fc1_w"] + params["fc1_b"])
    return y @ params["fc2_w"] + params["fc2_b"]


if __name__ == "__main__":
    key = jax.random.PRNGKey(0)
    k_param, k_in1, k_in2 = jax.random.split(key, 3)

    action_size = 4
    params = init_qnetwork_params(k_param, action_size)
    pre = preprocess_params(params, action_size)     # one-time preprocessing

    # 84x84x2 input is implied by the module: 84 -(k6,s2)-> 40 -(k8,s4)-> 9.
    # Small batch (bt=1 per step, 2 grid steps):
    x = jax.random.normal(k_in1, (2, 2, 84, 84), dtype=jnp.float32)
    out = qnetwork_forward(pre, x, action_size=action_size)
    jax.block_until_ready(out)
    assert out.shape == (2, action_size), out.shape
    ref = reference_forward(params, x)
    err = float(jnp.max(jnp.abs(out - ref)))
    assert bool(jnp.allclose(out, ref, atol=1e-2, rtol=1e-2)), err

    # Batch-blocked path (bt=4 per step, 2 grid steps):
    x8 = jax.random.normal(k_in2, (8, 2, 84, 84), dtype=jnp.float32)
    out8 = qnetwork_forward(pre, x8, action_size=action_size)
    jax.block_until_ready(out8)
    assert out8.shape == (8, action_size), out8.shape
    ref8 = reference_forward(params, x8)
    err8 = float(jnp.max(jnp.abs(out8 - ref8)))
    assert bool(jnp.allclose(out8, ref8, atol=1e-2, rtol=1e-2)), err8

    print("KERNEL_OK")
</pallas_src>

<mosaic_0001>
module attributes {stable_mosaic.version = 11 : i64} {
  func.func @_qnet_kernel(%arg0: i32, %arg1: memref<1x1152x128xbf16, #tpu.memory_space<vmem>>, %arg2: memref<64x1152xbf16, #tpu.memory_space<vmem>>, %arg3: memref<64x128xf32, #tpu.memory_space<vmem>>, %arg4: memref<4x16x64xf32, #tpu.memory_space<vmem>>, %arg5: memref<16x90xf32, #tpu.memory_space<vmem>>, %arg6: memref<4x90x1024xf32, #tpu.memory_space<vmem>>, %arg7: memref<1x256xf32, #tpu.memory_space<vmem>>, %arg8: memref<256x128xf32, #tpu.memory_space<vmem>>, %arg9: memref<1x128xf32, #tpu.memory_space<vmem>>, %arg10: memref<1x1x128xf32, #tpu.memory_space<vmem>>) attributes {dimension_semantics = [#tpu.dimension_semantics<parallel>], iteration_bounds = array<i64: 2>, scalar_prefetch = 0 : i64, scratch_operands = 0 : i64, tpu.core_type = #tpu.core_type<tc>, window_params = [{transform_indices = @transform_0, window_bounds = array<i64: 1, 1152, 128>}, {pipeline_mode = #tpu.pipeline_mode<synchronous>, transform_indices = @transform_1, window_bounds = array<i64: 64, 1152>}, {pipeline_mode = #tpu.pipeline_mode<synchronous>, transform_indices = @transform_2, window_bounds = array<i64: 64, 128>}, {pipeline_mode = #tpu.pipeline_mode<synchronous>, transform_indices = @transform_3, window_bounds = array<i64: 4, 16, 64>}, {pipeline_mode = #tpu.pipeline_mode<synchronous>, transform_indices = @transform_4, window_bounds = array<i64: 16, 90>}, {pipeline_mode = #tpu.pipeline_mode<synchronous>, transform_indices = @transform_5, window_bounds = array<i64: 4, 90, 1024>}, {pipeline_mode = #tpu.pipeline_mode<synchronous>, transform_indices = @transform_6, window_bounds = array<i64: 1, 256>}, {pipeline_mode = #tpu.pipeline_mode<synchronous>, transform_indices = @transform_7, window_bounds = array<i64: 256, 128>}, {pipeline_mode = #tpu.pipeline_mode<synchronous>, transform_indices = @transform_8, window_bounds = array<i64: 1, 128>}, {transform_indices = @transform_9, window_bounds = array<i64: 1, 1, 128>}]} {
    %c0 = arith.constant 0 : index
    %c0_0 = arith.constant 0 : index
    %0 = vector.load %arg2[%c0, %c0_0] : memref<64x1152xbf16, #tpu.memory_space<vmem>>, vector<64x1152xbf16>
    %c0_1 = arith.constant 0 : index
    %c0_2 = arith.constant 0 : index
    %c0_3 = arith.constant 0 : index
    %1 = vector.load %arg1[%c0_1, %c0_2, %c0_3] : memref<1x1152x128xbf16, #tpu.memory_space<vmem>>, vector<1x1152x128xbf16>
    %2 = vector.shape_cast %1 : vector<1x1152x128xbf16> to vector<1152x128xbf16>
    %cst = arith.constant dense<0.000000e+00> : vector<64x128xf32>
    %3 = tpu.matmul %0, %2, %cst {dimension_numbers = #tpu.dot_dimension_numbers<[1], [0], [0], [1], [0, 0, 1, 1], [], []>} : vector<64x1152xbf16>, vector<1152x128xbf16>, vector<64x128xf32> -> vector<64x128xf32>
    %4 = tpu.iota {dimensions = array<i32: 1>} : vector<64x128xi32>
    %c100_i32 = arith.constant 100 : i32
    %5 = vector.broadcast %c100_i32 : i32 to vector<64x128xi32>
    %6 = arith.cmpi slt, %4, %5 : vector<64x128xi32>
    %c0_4 = arith.constant 0 : index
    %c0_5 = arith.constant 0 : index
    %7 = vector.load %arg3[%c0_4, %c0_5] : memref<64x128xf32, #tpu.memory_space<vmem>>, vector<64x128xf32>
    %c0_6 = arith.constant 0 : index
    %c0_7 = arith.constant 0 : index
    %8 = vector.load %arg5[%c0_6, %c0_7] : memref<16x90xf32, #tpu.memory_space<vmem>>, vector<16x90xf32>
    %c0_8 = arith.constant 0 : index
    %c0_9 = arith.constant 0 : index
    %9 = vector.load %arg7[%c0_8, %c0_9] : memref<1x256xf32, #tpu.memory_space<vmem>>, vector<1x256xf32>
    %10 = arith.addf %3, %7 : vector<64x128xf32>
    %cst_10 = arith.constant 0.000000e+00 : f32
    %11 = vector.broadcast %cst_10 : f32 to vector<64x128xf32>
    %12 = arith.maximumf %10, %11 : vector<64x128xf32>
    %cst_11 = arith.constant 0.000000e+00 : f32
    %13 = vector.broadcast %cst_11 : f32 to vector<64x128xf32>
    %14 = arith.select %6, %12, %13 : vector<64x128xi1>, vector<64x128xf32>
    %c0_12 = arith.constant 0 : index
    %c0_13 = arith.constant 0 : index
    %c0_14 = arith.constant 0 : index
    %15 = vector.load %arg4[%c0_12, %c0_13, %c0_14] : memref<4x16x64xf32, #tpu.memory_space<vmem>>, vector<1x16x64xf32>
    %16 = vector.shape_cast %15 : vector<1x16x64xf32> to vector<16x64xf32>
    %17 = vector.extract_strided_slice %14 {offsets = [0, 0], sizes = [64, 90], strides = [1, 1]} : vector<64x128xf32> to vector<64x90xf32>
    %cst_15 = arith.constant dense<0.000000e+00> : vector<16x90xf32>
    %18 = tpu.matmul %16, %17, %cst_15 {dimension_numbers = #tpu.dot_dimension_numbers<[1], [0], [0], [1], [0, 0, 1, 1], [], []>} : vector<16x64xf32>, vector<64x90xf32>, vector<16x90xf32> -> vector<16x90xf32>
    %c1 = arith.constant 1 : index
    %c0_16 = arith.constant 0 : index
    %c0_17 = arith.constant 0 : index
    %19 = vector.load %arg4[%c1, %c0_16, %c0_17] : memref<4x16x64xf32, #tpu.memory_space<vmem>>, vector<1x16x64xf32>
    %20 = vector.shape_cast %19 : vector<1x16x64xf32> to vector<16x64xf32>
    %21 = vector.extract_strided_slice %14 {offsets = [0, 1], sizes = [64, 90], strides = [1, 1]} : vector<64x128xf32> to vector<64x90xf32>
    %cst_18 = arith.constant dense<0.000000e+00> : vector<16x90xf32>
    %22 = tpu.matmul %20, %21, %cst_18 {dimension_numbers = #tpu.dot_dimension_numbers<[1], [0], [0], [1], [0, 0, 1, 1], [], []>} : vector<16x64xf32>, vector<64x90xf32>, vector<16x90xf32> -> vector<16x90xf32>
    %23 = arith.addf %18, %22 : vector<16x90xf32>
    %c2 = arith.constant 2 : index
    %c0_19 = arith.constant 0 : index
    %c0_20 = arith.constant 0 : index
    %24 = vector.load %arg4[%c2, %c0_19, %c0_20] : memref<4x16x64xf32, #tpu.memory_space<vmem>>, vector<1x16x64xf32>
    %25 = vector.shape_cast %24 : vector<1x16x64xf32> to vector<16x64xf32>
    %26 = vector.extract_strided_slice %14 {offsets = [0, 10], sizes = [64, 90], strides = [1, 1]} : vector<64x128xf32> to vector<64x90xf32>
    %cst_21 = arith.constant dense<0.000000e+00> : vector<16x90xf32>
    %27 = tpu.matmul %25, %26, %cst_21 {dimension_numbers = #tpu.dot_dimension_numbers<[1], [0], [0], [1], [0, 0, 1, 1], [], []>} : vector<16x64xf32>, vector<64x90xf32>, vector<16x90xf32> -> vector<16x90xf32>
    %28 = arith.addf %23, %27 : vector<16x90xf32>
    %c3 = arith.constant 3 : index
    %c0_22 = arith.constant 0 : index
    %c0_23 = arith.constant 0 : index
    %29 = vector.load %arg4[%c3, %c0_22, %c0_23] : memref<4x16x64xf32, #tpu.memory_space<vmem>>, vector<1x16x64xf32>
    %30 = vector.shape_cast %29 : vector<1x16x64xf32> to vector<16x64xf32>
    %31 = vector.extract_strided_slice %14 {offsets = [0, 11], sizes = [64, 90], strides = [1, 1]} : vector<64x128xf32> to vector<64x90xf32>
    %cst_24 = arith.constant dense<0.000000e+00> : vector<16x90xf32>
    %32 = tpu.matmul %30, %31, %cst_24 {dimension_numbers = #tpu.dot_dimension_numbers<[1], [0], [0], [1], [0, 0, 1, 1], [], []>} : vector<16x64xf32>, vector<64x90xf32>, vector<16x90xf32> -> vector<16x90xf32>
    %33 = arith.addf %28, %32 : vector<16x90xf32>
    %34 = arith.addf %33, %8 : vector<16x90xf32>
    %cst_25 = arith.constant 0.000000e+00 : f32
    %35 = vector.broadcast %cst_25 : f32 to vector<16x90xf32>
    %36 = arith.maximumf %34, %35 : vector<16x90xf32>
    %37 = vector.extract_strided_slice %36 {offsets = [0, 0], sizes = [4, 90], strides = [1, 1]} : vector<16x90xf32> to vector<4x90xf32>
    %c0_26 = arith.constant 0 : index
    %c0_27 = arith.constant 0 : index
    %c0_28 = arith.constant 0 : index
    %38 = vector.load %arg6[%c0_26, %c0_27, %c0_28] : memref<4x90x1024xf32, #tpu.memory_space<vmem>>, vector<1x90x1024xf32>
    %39 = vector.shape_cast %38 : vector<1x90x1024xf32> to vector<90x1024xf32>
    %cst_29 = arith.constant dense<0.000000e+00> : vector<4x1024xf32>
    %40 = tpu.matmul %37, %39, %cst_29 {dimension_numbers = #tpu.dot_dimension_numbers<[1], [0], [0], [1], [0, 0, 1, 1], [], []>} : vector<4x90xf32>, vector<90x1024xf32>, vector<4x1024xf32> -> vector<4x1024xf32>
    %41 = vector.extract_strided_slice %36 {offsets = [4, 0], sizes = [4, 90], strides = [1, 1]} : vector<16x90xf32> to vector<4x90xf32>
    %c1_30 = arith.constant 1 : index
    %c0_31 = arith.constant 0 : index
    %c0_32 = arith.constant 0 : index
    %42 = vector.load %arg6[%c1_30, %c0_31, %c0_32] : memref<4x90x1024xf32, #tpu.memory_space<vmem>>, vector<1x90x1024xf32>
    %43 = vector.shape_cast %42 : vector<1x90x1024xf32> to vector<90x1024xf32>
    %cst_33 = arith.constant dense<0.000000e+00> : vector<4x1024xf32>
    %44 = tpu.matmul %41, %43, %cst_33 {dimension_numbers = #tpu.dot_dimension_numbers<[1], [0], [0], [1], [0, 0, 1, 1], [], []>} : vector<4x90xf32>, vector<90x1024xf32>, vector<4x1024xf32> -> vector<4x1024xf32>
    %45 = arith.addf %40, %44 : vector<4x1024xf32>
    %46 = vector.extract_strided_slice %36 {offsets = [8, 0], sizes = [4, 90], strides = [1, 1]} : vector<16x90xf32> to vector<4x90xf32>
    %c2_34 = arith.constant 2 : index
    %c0_35 = arith.constant 0 : index
    %c0_36 = arith.constant 0 : index
    %47 = vector.load %arg6[%c2_34, %c0_35, %c0_36] : memref<4x90x1024xf32, #tpu.memory_space<vmem>>, vector<1x90x1024xf32>
    %48 = vector.shape_cast %47 : vector<1x90x1024xf32> to vector<90x1024xf32>
    %cst_37 = arith.constant dense<0.000000e+00> : vector<4x1024xf32>
    %49 = tpu.matmul %46, %48, %cst_37 {dimension_numbers = #tpu.dot_dimension_numbers<[1], [0], [0], [1], [0, 0, 1, 1], [], []>} : vector<4x90xf32>, vector<90x1024xf32>, vector<4x1024xf32> -> vector<4x1024xf32>
    %50 = arith.addf %45, %49 : vector<4x1024xf32>
    %51 = vector.extract_strided_slice %36 {offsets = [12, 0], sizes = [4, 90], strides = [1, 1]} : vector<16x90xf32> to vector<4x90xf32>
    %c3_38 = arith.constant 3 : index
    %c0_39 = arith.constant 0 : index
    %c0_40 = arith.constant 0 : index
    %52 = vector.load %arg6[%c3_38, %c0_39, %c0_40] : memref<4x90x1024xf32, #tpu.memory_space<vmem>>, vector<1x90x1024xf32>
    %53 = vector.shape_cast %52 : vector<1x90x1024xf32> to vector<90x1024xf32>
    %cst_41 = arith.constant dense<0.000000e+00> : vector<4x1024xf32>
    %54 = tpu.matmul %51, %53, %cst_41 {dimension_numbers = #tpu.dot_dimension_numbers<[1], [0], [0], [1], [0, 0, 1, 1], [], []>} : vector<4x90xf32>, vector<90x1024xf32>, vector<4x1024xf32> -> vector<4x1024xf32>
    %55 = arith.addf %50, %54 : vector<4x1024xf32>
    %56 = vector.extract_strided_slice %55 {offsets = [0, 0], sizes = [1, 256], strides = [1, 1]} : vector<4x1024xf32> to vector<1x256xf32>
    %57 = arith.addf %9, %56 : vector<1x256xf32>
    %58 = vector.extract_strided_slice %55 {offsets = [1, 256], sizes = [1, 256], strides = [1, 1]} : vector<4x1024xf32> to vector<1x256xf32>
    %59 = arith.addf %57, %58 : vector<1x256xf32>
    %60 = vector.extract_strided_slice %55 {offsets = [2, 512], sizes = [1, 256], strides = [1, 1]} : vector<4x1024xf32> to vector<1x256xf32>
    %61 = vector.extract_strided_slice %55 {offsets = [3, 768], sizes = [1, 256], strides = [1, 1]} : vector<4x1024xf32> to vector<1x256xf32>
    %62 = arith.addf %60, %61 : vector<1x256xf32>
    %63 = arith.addf %59, %62 : vector<1x256xf32>
    %cst_42 = arith.constant 0.000000e+00 : f32
    %64 = vector.broadcast %cst_42 : f32 to vector<1x256xf32>
    %65 = arith.maximumf %63, %64 : vector<1x256xf32>
    %c0_43 = arith.constant 0 : index
    %c0_44 = arith.constant 0 : index
    %66 = vector.load %arg8[%c0_43, %c0_44] : memref<256x128xf32, #tpu.memory_space<vmem>>, vector<256x128xf32>
    %cst_45 = arith.constant dense<0.000000e+00> : vector<1x128xf32>
    %67 = tpu.matmul %65, %66, %cst_45 {dimension_numbers = #tpu.dot_dimension_numbers<[1], [0], [0], [1], [0, 0, 1, 1], [], []>} : vector<1x256xf32>, vector<256x128xf32>, vector<1x128xf32> -> vector<1x128xf32>
    %c0_46 = arith.constant 0 : index
    %c0_47 = arith.constant 0 : index
    %68 = vector.load %arg9[%c0_46, %c0_47] : memref<1x128xf32, #tpu.memory_space<vmem>>, vector<1x128xf32>
    %69 = arith.addf %67, %68 : vector<1x128xf32>
    %c0_48 = arith.constant 0 : index
    %c0_49 = arith.constant 0 : index
    %c0_50 = arith.constant 0 : index
    %70 = vector.load %arg10[%c0_48, %c0_49, %c0_50] : memref<1x1x128xf32, #tpu.memory_space<vmem>>, vector<1x1x128xf32>
    %71 = vector.shape_cast %70 : vector<1x1x128xf32> to vector<1x128xf32>
    %72 = vector.shape_cast %69 : vector<1x128xf32> to vector<1x1x128xf32>
    tpu.vector_store %arg10[%c0_48, %c0_49, %c0_50], %72 {strides = array<i32>} : memref<1x1x128xf32, #tpu.memory_space<vmem>>, vector<1x1x128xf32>,
    return
  }
  func.func @transform_0(%arg0: i32) -> (i32, i32, i32) {
    %c0_i32 = arith.constant 0 : i32
    %c0_i32_0 = arith.constant 0 : i32
    %c0_i32_1 = arith.constant 0 : i32
    return %arg0, %c0_i32, %c0_i32_0 : i32, i32, i32
  }
  func.func @transform_1(%arg0: i32) -> (i32, i32) {
    %c0_i32 = arith.constant 0 : i32
    %c0_i32_0 = arith.constant 0 : i32
    %c0_i32_1 = arith.constant 0 : i32
    return %c0_i32, %c0_i32_0 : i32, i32
  }
  func.func @transform_2(%arg0: i32) -> (i32, i32) {
    %c0_i32 = arith.constant 0 : i32
    %c0_i32_0 = arith.constant 0 : i32
    %c0_i32_1 = arith.constant 0 : i32
    return %c0_i32, %c0_i32_0 : i32, i32
  }
  func.func @transform_3(%arg0: i32) -> (i32, i32, i32) {
    %c0_i32 = arith.constant 0 : i32
    %c0_i32_0 = arith.constant 0 : i32
    %c0_i32_1 = arith.constant 0 : i32
    %c0_i32_2 = arith.constant 0 : i32
    return %c0_i32, %c0_i32_0, %c0_i32_1 : i32, i32, i32
  }
  func.func @transform_4(%arg0: i32) -> (i32, i32) {
    %c0_i32 = arith.constant 0 : i32
    %c0_i32_0 = arith.constant 0 : i32
    %c0_i32_1 = arith.constant 0 : i32
    return %c0_i32, %c0_i32_0 : i32, i32
  }
  func.func @transform_5(%arg0: i32) -> (i32, i32, i32) {
    %c0_i32 = arith.constant 0 : i32
    %c0_i32_0 = arith.constant 0 : i32
    %c0_i32_1 = arith.constant 0 : i32
    %c0_i32_2 = arith.constant 0 : i32
    return %c0_i32, %c0_i32_0, %c0_i32_1 : i32, i32, i32
  }
  func.func @transform_6(%arg0: i32) -> (i32, i32) {
    %c0_i32 = arith.constant 0 : i32
    %c0_i32_0 = arith.constant 0 : i32
    %c0_i32_1 = arith.constant 0 : i32
    return %c0_i32, %c0_i32_0 : i32, i32
  }
  func.func @transform_7(%arg0: i32) -> (i32, i32) {
    %c0_i32 = arith.constant 0 : i32
    %c0_i32_0 = arith.constant 0 : i32
    %c0_i32_1 = arith.constant 0 : i32
    return %c0_i32, %c0_i32_0 : i32, i32
  }
  func.func @transform_8(%arg0: i32) -> (i32, i32) {
    %c0_i32 = arith.constant 0 : i32
    %c0_i32_0 = arith.constant 0 : i32
    %c0_i32_1 = arith.constant 0 : i32
    return %c0_i32, %c0_i32_0 : i32, i32
  }
  func.func @transform_9(%arg0: i32) -> (i32, i32, i32) {
    %c0_i32 = arith.constant 0 : i32
    %c0_i32_0 = arith.constant 0 : i32
    %c0_i32_1 = arith.constant 0 : i32
    return %arg0, %c0_i32, %c0_i32_0 : i32, i32, i32
  }
}

</mosaic_0001>

<bundles_post_ra>
// kernel: qnetwork_forward.1
= control target key start
LH: loop header
LB: loop body
LE: loop exit
PB: predicated region body
PF: predicated region fallthrough
CT: control target
= control target key end

     0   :  { %s6069_s0 = inlined_call_operand.vmem [shape: bf16[2,1152,128], index: 0, kind: input, shape index: {}]   ;;  %s6070_s1 = inlined_call_operand.vmem [shape: bf16[64,1152], index: 1, kind: input, shape index: {}]   ;;  %s6071_s2 = inlined_call_operand.vmem [shape: f32[64,128], index: 2, kind: input, shape index: {}]   ;;  %s6072_s3 = inlined_call_operand.vmem [shape: f32[4,16,64], index: 3, kind: input, shape index: {}]   ;;  %s6073_s4 = inlined_call_operand.vmem [shape: f32[16,90], index: 4, kind: input, shape index: {}]   ;;  %s6074_s5 = inlined_call_operand.vmem [shape: f32[4,90,1024], index: 5, kind: input, shape index: {}]   ;;  %s6075_s6 = inlined_call_operand.vmem [shape: f32[1,256], index: 6, kind: input, shape index: {}]   ;;  %s6076_s7 = inlined_call_operand.vmem [shape: f32[256,128], index: 7, kind: input, shape index: {}]   ;;  %s6077_s8 = inlined_call_operand.vmem [shape: f32[1,128], index: 8, kind: input, shape index: {}]   ;;  %s6078_s9 = inlined_call_operand.hbm [shape: f32[2,1,128], index: 9, kind: output, shape index: {}]  }
   0x1   :  { %6079 = sst [smem:[#allocation5_spill]] %s6069_s0 }
   0x2   :  { %14 = vsyncpa [#allocation3], 0 }
   0x3   :  { %16 = vsyncpa [#allocation3 + $0x1], 0  ;;  %s4118_s30 = smov 0   ;;  %s4120_s10 = smov 0  }
   0x4   :  { %s4122_s11 = smov 0   ;;  %s4124_s12 = smov 0  }
   0x5 LB: > { %s4139_s13 = sadd.s32 4294967295, %s4063_s12   ;;  %s2969_s14 = sadd.s32 4294967294, %s4063_s12   ;;  %s4063_s12 = sphi %s4124_s12, %s6086_s12   ;;  %s4059_s11 = sphi %s4122_s11, %s6085_s11   ;;  %s4055_s10 = sphi %s4120_s10, %s6084_s10   ;;  %s4051_s30 = sphi %s4118_s30, %s6083_s30  }
   0x6   : > { %s4143_s15 = sadd.s32 1, %s4063_s12   ;;  %s223_s16 = sadd.s32 1, %s4059_s11 }
   0x7   : > { %s220_s17 = ssub.s32 %s4063_s12, %s4143_s15  ;;  %p233_p0 = scmp.ne.s32.totalorder %s4059_s11, %s4055_s10 }
   0x8   : > { %p221_p1 = scmp.eq.s32.totalorder %s220_s17, 0  ;;  %p234_p2 = scmp.eq.s32.totalorder %s4139_s13, 1 }
   0x9   : > { %p239_p3 = scmp.ne.s32.totalorder %s4055_s10, %s4051_s30  ;;  %p240_p4 = scmp.eq.s32.totalorder %s2969_s14, 1 }
   0xa   : > { %s4154_s18 = scalar_select %p221_p1, %s4059_s11, %s223_s16  }
   0xb   : > { %p4156_p5 = por %p234_p2, %p233_p0  ;;  %p4160_p6 = por %p240_p4, %p239_p3 }
   0xc   : > { %p2972_p7 = scmp.ge.s32.totalorder %s4063_s12, 1  ;;  %p290_p8 = scmp.lt.s32.totalorder %s4063_s12, 3 }
   0xe   : > { %p291_p9 = pnand %p2972_p7, %p290_p8 }
   0xf   : > { %p325_p10 = scmp.lt.s32.totalorder (!%p291_p9), %s4139_s13, 1  ;;  %s6082_s0 = sld [smem:[#allocation5_spill]] (!%p291_p9) }
  0x10   : > { %294 = sbr.rel (%p291_p9) target bundleno = 1109 (0x455), region = 56  ;;  %s4065_s27 = smov (!%p291_p9), 118  }
  0x11   : > { %s4066_s28 = smov (!%p291_p9), 127   ;;  %s4067_s29 = smov (!%p291_p9), 117  }
  0x12   : > { %s323_s26 = sand.u32 (!%p291_p9), 1, %s4055_s10  }
  0x13   : > { %s324_s17 = scalar_lea.vmem (!%p291_p9), [#allocation2], %s323_s26 }
  0x15   : > { %s326_s21 = scalar_select %p325_p10, %s4139_s13, 1  ;;  %v2976_v28 = vld [vmem:[%s6070_s1] sm:$0xf]  ;;  %v3786_v29 = vld [vmem:[%s6070_s1 + $0x20] sm:$0xf0]  ;;  %vm1458_vm1 = vcmask 523264  }
  0x16   : > { %v3782_v30 = vld [vmem:[%s6070_s1 + $0x4] sm:$0xf]  ;;  %v2978_v35 = vld [vmem:[%s6070_s1 + $0x24] sm:$0xf0]  ;;  %v3787_v37 = vld [vmem:[%s6070_s1 + $0x28] sm:$0xf0]  ;;  %v2977_v40 = vor.u32 %v3786_v29, %v2976_v28 }
  0x17   : > { %s3898_s22 = smul.u32 576, %s326_s21  ;;  %v2984_v36 = vld [vmem:[%s6070_s1 + $0x8] sm:$0xf]  ;;  %v3783_v38 = vld [vmem:[%s6070_s1 + $0xc] sm:$0xf]  ;;  %v2981_v41 = vor.u32 %v3782_v30, %v2978_v35  ;;  %vm1835_vm2 = vcmask 1041408  }
  0x18   : > { %v2986_v39 = vld [vmem:[%s6070_s1 + $0x2c] sm:$0xf0]  ;;  %v2985_v42 = vor.u32 %v3787_v37, %v2984_v36  ;;  %v3012_v54 = vld [vmem:[%s6070_s1 + $0x48] sm:$0xf]  ;;  %v3795_v57 = vld [vmem:[%s6070_s1 + $0x68] sm:$0xf0] }
  0x19   : > { %s4171_s25 = scalar_lea.vmem %s6082_s0, %s3898_s22  ;;  %v2989_v43 = vor.u32 %v3783_v38, %v2986_v39  ;;  %v3791_v58 = vld [vmem:[%s6070_s1 + $0x4c] sm:$0xf]  ;;  %v3014_v59 = vld [vmem:[%s6070_s1 + $0x6c] sm:$0xf0]  ;;  %v3796_v61 = vld [vmem:[%s6070_s1 + $0x70] sm:$0xf0] }
  0x1a   : > { %v3825_v0 = vld [vmem:[%s4171_s25 + $0x38] sm:$0xff]  ;;  %v3824_v4 = vld [vmem:[%s4171_s25 + $0x30] sm:$0xff]  ;;  %v3823_v8 = vld [vmem:[%s4171_s25 + $0x28] sm:$0xff]  ;;  %vm1832_vm3 = vcmask 736256   ;;  %vm2793_vm4 = vcmask 1040384   ;;  %s2912_s21 = sshll.u32 %s324_s17, 4  ;;  %s2913_s21 = int_to_ptr.vmem [resolvable:$true] %s2912_s21 }
  0x1b   : > { %v3833_v1 = vld [vmem:[%s4171_s25 + $0x78] sm:$0xff]  ;;  %1144 = vmatpush.bf16.msra.mxu0 %v3825_v0  ;;  %v3832_v5 = vld [vmem:[%s4171_s25 + $0x70] sm:$0xff]  ;;  %v3831_v9 = vld [vmem:[%s4171_s25 + $0x68] sm:$0xff]  ;;  %s2902_s0 = scalar_lea.sflag [#allocation3], %s323_s26 }
  0x1c   : > { %v3841_v2 = vld [vmem:[%s4171_s25 + $0xb8] sm:$0xff]  ;;  %1173 = vmatpush.bf16.msra.mxu1 %v3833_v1  ;;  %v3840_v6 = vld [vmem:[%s4171_s25 + $0xb0] sm:$0xff]  ;;  %v3839_v10 = vld [vmem:[%s4171_s25 + $0xa8] sm:$0xff] }
  0x1d   : > { %v3849_v3 = vld [vmem:[%s4171_s25 + $0xf8] sm:$0xff]  ;;  %1202 = vmatpush.bf16.msra.mxu2 %v3841_v2  ;;  %v3848_v7 = vld [vmem:[%s4171_s25 + $0xf0] sm:$0xff]  ;;  %v3847_v11 = vld [vmem:[%s4171_s25 + $0xe8] sm:$0xff] }
  0x1e   : > { %1231 = vmatpush.bf16.msra.mxu3 %v3849_v3  ;;  %v3822_v12 = vld [vmem:[%s4171_s25 + $0x20] sm:$0xff]  ;;  %v3821_v16 = vld [vmem:[%s4171_s25 + $0x18] sm:$0xff]  ;;  %v3820_v20 = vld [vmem:[%s4171_s25 + $0x10] sm:$0xff] }
  0x1f   : > { %1145 = vmatpush.bf16.msra.mxu0 %v3824_v4  ;;  %v3830_v13 = vld [vmem:[%s4171_s25 + $0x60] sm:$0xff]  ;;  %v3829_v17 = vld [vmem:[%s4171_s25 + $0x58] sm:$0xff]  ;;  %v3828_v21 = vld [vmem:[%s4171_s25 + $0x50] sm:$0xff]  ;;  %v3013_v4 = vor.u32 %v3795_v57, %v3012_v54 }
  0x20   : > { %1174 = vmatpush.bf16.msra.mxu1 %v3832_v5  ;;  %v3838_v14 = vld [vmem:[%s4171_s25 + $0xa0] sm:$0xff]  ;;  %v3837_v18 = vld [vmem:[%s4171_s25 + $0x98] sm:$0xff]  ;;  %v3836_v22 = vld [vmem:[%s4171_s25 + $0x90] sm:$0xff]  ;;  %v3017_v5 = vor.u32 %v3791_v58, %v3014_v59 }
  0x21   : > { %1203 = vmatpush.bf16.msra.mxu2 %v3840_v6  ;;  %v3846_v15 = vld [vmem:[%s4171_s25 + $0xe0] sm:$0xff]  ;;  %v3845_v19 = vld [vmem:[%s4171_s25 + $0xd8] sm:$0xff]  ;;  %v3844_v23 = vld [vmem:[%s4171_s25 + $0xd0] sm:$0xff] }
  0x22   : > { %1232 = vmatpush.bf16.msra.mxu3 %v3848_v7  ;;  %v3819_v24 = vld [vmem:[%s4171_s25 + $0x8] sm:$0xff]  ;;  %v3818_v31 = vld [vmem:[%s4171_s25] sm:$0xff]  ;;  %v3857_v44 = vld [vmem:[%s4171_s25 + $0x138] sm:$0xff] }
  0x23   : > { %1146 = vmatpush.bf16.msra.mxu0 %v3823_v8  ;;  %v3827_v25 = vld [vmem:[%s4171_s25 + $0x48] sm:$0xff]  ;;  %v3826_v32 = vld [vmem:[%s4171_s25 + $0x40] sm:$0xff]  ;;  %v3865_v45 = vld [vmem:[%s4171_s25 + $0x178] sm:$0xff] }
  0x24   : > { %1175 = vmatpush.bf16.msra.mxu1 %v3831_v9  ;;  %v3835_v26 = vld [vmem:[%s4171_s25 + $0x88] sm:$0xff]  ;;  %v3834_v33 = vld [vmem:[%s4171_s25 + $0x80] sm:$0xff]  ;;  %v3873_v46 = vld [vmem:[%s4171_s25 + $0x1b8] sm:$0xff] }
  0x25   : > { %1204 = vmatpush.bf16.msra.mxu2 %v3839_v10  ;;  %v3843_v27 = vld [vmem:[%s4171_s25 + $0xc8] sm:$0xff]  ;;  %v3842_v34 = vld [vmem:[%s4171_s25 + $0xc0] sm:$0xff]  ;;  %v3881_v47 = vld [vmem:[%s4171_s25 + $0x1f8] sm:$0xff] }
  0x26   : > { %1233 = vmatpush.bf16.msra.mxu3 %v3847_v11  ;;  %v3856_v48 = vld [vmem:[%s4171_s25 + $0x130] sm:$0xff]  ;;  %v3855_v52 = vld [vmem:[%s4171_s25 + $0x128] sm:$0xff]  ;;  %v3022_v63 = vld [vmem:[%s6070_s1 + $0x74] sm:$0xf0] }
  0x27   : > { %1147 = vmatpush.bf16.msra.mxu0 %v3822_v12  ;;  %v3864_v49 = vld [vmem:[%s4171_s25 + $0x170] sm:$0xff]  ;;  %v3863_v53 = vld [vmem:[%s4171_s25 + $0x168] sm:$0xff]  ;;  %v3854_v0 = vld [vmem:[%s4171_s25 + $0x120] sm:$0xff] }
  0x28   : > { %1176 = vmatpush.bf16.msra.mxu1 %v3830_v13  ;;  %v3872_v50 = vld [vmem:[%s4171_s25 + $0x1b0] sm:$0xff]  ;;  %v3871_v55 = vld [vmem:[%s4171_s25 + $0x1a8] sm:$0xff]  ;;  %v3862_v1 = vld [vmem:[%s4171_s25 + $0x160] sm:$0xff] }
  0x29   : > { %1205 = vmatpush.bf16.msra.mxu2 %v3838_v14  ;;  %v3880_v51 = vld [vmem:[%s4171_s25 + $0x1f0] sm:$0xff]  ;;  %v3879_v56 = vld [vmem:[%s4171_s25 + $0x1e8] sm:$0xff]  ;;  %v3870_v2 = vld [vmem:[%s4171_s25 + $0x1a0] sm:$0xff] }
  0x2a   : > { %1234 = vmatpush.bf16.msra.mxu3 %v3846_v15  ;;  %v3020_v60 = vld [vmem:[%s6070_s1 + $0x50] sm:$0xf]  ;;  %v3792_v62 = vld [vmem:[%s6070_s1 + $0x54] sm:$0xf]  ;;  %v3878_v3 = vld [vmem:[%s4171_s25 + $0x1e0] sm:$0xff] }
  0x2b   : > { %1148 = vmatpush.bf16.msra.mxu0 %v3821_v16  ;;  %v3021_v6 = vor.u32 %v3796_v61, %v3020_v60  ;;  %v3025_v7 = vor.u32 %v3792_v62, %v3022_v63  ;;  %v3853_v8 = vld [vmem:[%s4171_s25 + $0x118] sm:$0xff]  ;;  %v3852_v12 = vld [vmem:[%s4171_s25 + $0x110] sm:$0xff]  ;;  %v3851_v16 = vld [vmem:[%s4171_s25 + $0x108] sm:$0xff] }
  0x2c   : > { %1177 = vmatpush.bf16.msra.mxu1 %v3829_v17  ;;  %v3861_v9 = vld [vmem:[%s4171_s25 + $0x158] sm:$0xff]  ;;  %v3860_v13 = vld [vmem:[%s4171_s25 + $0x150] sm:$0xff]  ;;  %v3859_v17 = vld [vmem:[%s4171_s25 + $0x148] sm:$0xff] }
  0x2d   : > { %1206 = vmatpush.bf16.msra.mxu2 %v3837_v18  ;;  %v3869_v10 = vld [vmem:[%s4171_s25 + $0x198] sm:$0xff]  ;;  %v3868_v14 = vld [vmem:[%s4171_s25 + $0x190] sm:$0xff]  ;;  %v3850_v28 = vld [vmem:[%s4171_s25 + $0x100] sm:$0xff] }
  0x2e   : > { %1235 = vmatpush.bf16.msra.mxu3 %v3845_v19  ;;  %v3877_v11 = vld [vmem:[%s4171_s25 + $0x1d8] sm:$0xff]  ;;  %v3876_v15 = vld [vmem:[%s4171_s25 + $0x1d0] sm:$0xff]  ;;  %v3867_v19 = vld [vmem:[%s4171_s25 + $0x188] sm:$0xff] }
  0x2f   : > { %1149 = vmatpush.bf16.msra.mxu0 %v3820_v20  ;;  %v3048_v18 = vld [vmem:[%s6070_s1 + $0x90] sm:$0xf]  ;;  %v3875_v20 = vld [vmem:[%s4171_s25 + $0x1c8] sm:$0xff]  ;;  %v3858_v29 = vld [vmem:[%s4171_s25 + $0x140] sm:$0xff] }
  0x30   : > { %1178 = vmatpush.bf16.msra.mxu1 %v3828_v21  ;;  %v3804_v21 = vld [vmem:[%s6070_s1 + $0xb0] sm:$0xf0]  ;;  %v3866_v30 = vld [vmem:[%s4171_s25 + $0x180] sm:$0xff]  ;;  %v3084_v36 = vld [vmem:[%s6070_s1 + $0xd8] sm:$0xf] }
  0x31   : > { %1207 = vmatpush.bf16.msra.mxu2 %v3836_v22  ;;  %v3800_v22 = vld [vmem:[%s6070_s1 + $0x94] sm:$0xf]  ;;  %v3813_v37 = vld [vmem:[%s6070_s1 + $0xf8] sm:$0xf0]  ;;  %v3086_v39 = vld [vmem:[%s6070_s1 + $0xfc] sm:$0xf0] }
  0x32   : > { %1236 = vmatpush.bf16.msra.mxu3 %v3844_v23  ;;  %v3050_v23 = vld [vmem:[%s6070_s1 + $0xb4] sm:$0xf0]  ;;  %v3809_v38 = vld [vmem:[%s6070_s1 + $0xdc] sm:$0xf]  ;;  %v3888_v61 = vld [vmem:[%s4171_s25 + $0x230] sm:$0xff] }
  0x33   : > { %1150 = vmatpush.bf16.msra.mxu0 %v3819_v24  ;;  %v3056_v24 = vld [vmem:[%s6070_s1 + $0x98] sm:$0xf]  ;;  %v3785_v54 = vld [vmem:[%s6070_s1 + $0x1c] sm:$0xf]  ;;  %v3887_v62 = vld [vmem:[%s4171_s25 + $0x228] sm:$0xff] }
  0x34   : > { %1179 = vmatpush.bf16.msra.mxu1 %v3827_v25  ;;  %v3805_v25 = vld [vmem:[%s6070_s1 + $0xb8] sm:$0xf0]  ;;  %v3028_v63 = vld [vmem:[%s6070_s1 + $0x58] sm:$0xf] }
  0x35   : > { %1208 = vmatpush.bf16.msra.mxu2 %v3835_v26  ;;  %v3801_v26 = vld [vmem:[%s6070_s1 + $0x9c] sm:$0xf] }
  0x36   : > { %1237 = vmatpush.bf16.msra.mxu3 %v3843_v27  ;;  %v3058_v27 = vld [vmem:[%s6070_s1 + $0xbc] sm:$0xf0]  ;;  %v3889_v60 = vld [vmem:[%s4171_s25 + $0x238] sm:$0xff] }
  0x37   : > { %1151 = vmatpush.bf16.msra.mxu0 %v3818_v31  ;;  %v3874_v31 = vld [vmem:[%s4171_s25 + $0x1c0] sm:$0xff]  ;;  %v3061_v35 = vor.u32 %v3801_v26, %v3058_v27 }
  0x38   : > { %1180 = vmatpush.bf16.msra.mxu1 %v3826_v32  ;;  %v3049_v32 = vor.u32 %v3804_v21, %v3048_v18  ;;  %v3066_v18 = vld [vmem:[%s6070_s1 + $0xc4] sm:$0xf0]  ;;  %v3803_v21 = vld [vmem:[%s6070_s1 + $0xac] sm:$0xf] }
  0x39   : > { %1209 = vmatpush.bf16.msra.mxu2 %v3834_v33  ;;  %v3053_v33 = vor.u32 %v3800_v22, %v3050_v23  ;;  %v3074_v22 = vld [vmem:[%s6070_s1 + $0xcc] sm:$0xf0] }
  0x3a   : > { %1238 = vmatpush.bf16.msra.mxu3 %v3842_v34  ;;  %1152 = vmatmul.bf16.vlgmr.msra.gmra.mxu0 %v2977_v40  ;;  %v3057_v34 = vor.u32 %v3805_v25, %v3056_v24  ;;  %v3092_v40 = vld [vmem:[%s6070_s1 + $0xe0] sm:$0xf]  ;;  %v3077_v27 = vor.u32 %v3803_v21, %v3074_v22 }
  0x3b   : > { %1181 = vmatmul.bf16.vlgmr.msra.gmra.mxu1 %v2981_v41  ;;  %1260 = vmatpush.bf16.msrb.mxu0 %v3857_v44  ;;  %v3814_v41 = vld [vmem:[%s6070_s1 + $0x100] sm:$0xf0]  ;;  %v3085_v44 = vor.u32 %v3813_v37, %v3084_v36 }
  0x3c   : > { %1210 = vmatmul.bf16.vlgmr.msra.gmra.mxu2 %v2985_v42  ;;  %1289 = vmatpush.bf16.msrb.mxu1 %v3865_v45  ;;  %v3810_v42 = vld [vmem:[%s6070_s1 + $0xe4] sm:$0xf]  ;;  %v3089_v45 = vor.u32 %v3809_v38, %v3086_v39 }
  0x3d   : > { %1239 = vmatmul.bf16.vlgmr.msra.gmra.mxu3 %v2989_v43  ;;  %1318 = vmatpush.bf16.msrb.mxu2 %v3873_v46  ;;  %v3094_v43 = vld [vmem:[%s6070_s1 + $0x104] sm:$0xf0]  ;;  %v3093_v46 = vor.u32 %v3814_v41, %v3092_v40  ;;  %v3882_v25 = vld [vmem:[%s4171_s25 + $0x200] sm:$0xff] }
  0x3e   : > { %1347 = vmatpush.bf16.msrb.mxu3 %v3881_v47  ;;  %v3097_v47 = vor.u32 %v3810_v42, %v3094_v43  ;;  %v3008_v40 = vld [vmem:[%s6070_s1 + $0x20] sm:$0xf]  ;;  %v3790_v41 = vld [vmem:[%s6070_s1 + $0x40] sm:$0xf0]  ;;  %v3116_v42 = vld [vmem:[%s6070_s1 + $0xf8] sm:$0xf] }
  0x3f   : > { %1261 = vmatpush.bf16.msrb.mxu0 %v3856_v48  ;;  %v2992_v48 = vld [vmem:[%s6070_s1 + $0x10] sm:$0xf]  ;;  %v3817_v43 = vld [vmem:[%s6070_s1 + $0x118] sm:$0xf0] }
  0x40   : > { %1290 = vmatpush.bf16.msrb.mxu1 %v3864_v49  ;;  %v3788_v49 = vld [vmem:[%s6070_s1 + $0x30] sm:$0xf0] }
  0x41   : > { %1319 = vmatpush.bf16.msrb.mxu2 %v3872_v50  ;;  %v3784_v50 = vld [vmem:[%s6070_s1 + $0x14] sm:$0xf] }
  0x42   : > { %1348 = vmatpush.bf16.msrb.mxu3 %v3880_v51  ;;  %v2994_v51 = vld [vmem:[%s6070_s1 + $0x34] sm:$0xf0] }
  0x43   : > { %1262 = vmatpush.bf16.msrb.mxu0 %v3855_v52  ;;  %v3000_v52 = vld [vmem:[%s6070_s1 + $0x18] sm:$0xf]  ;;  %v2997_v57 = vor.u32 %v3784_v50, %v2994_v51 }
  0x44   : > { %1291 = vmatpush.bf16.msrb.mxu1 %v3863_v53  ;;  %v3789_v53 = vld [vmem:[%s6070_s1 + $0x38] sm:$0xf0] }
  0x45   : > { %1320 = vmatpush.bf16.msrb.mxu2 %v3871_v55  ;;  %v3002_v55 = vld [vmem:[%s6070_s1 + $0x3c] sm:$0xf0]  ;;  %v3001_v58 = vor.u32 %v3789_v53, %v3000_v52  ;;  %v3044_v52 = vld [vmem:[%s6070_s1 + $0x68] sm:$0xf]  ;;  %v3799_v53 = vld [vmem:[%s6070_s1 + $0x88] sm:$0xf0] }
  0x46   : > { %1349 = vmatpush.bf16.msrb.mxu3 %v3879_v56  ;;  %v2993_v56 = vor.u32 %v3788_v49, %v2992_v48  ;;  %v3005_v59 = vor.u32 %v3785_v54, %v3002_v55 }
  0x47   : > { %1263 = vmatpush.bf16.msrb.mxu0 %v3854_v0  ;;  %v3797_v0 = vld [vmem:[%s6070_s1 + $0x78] sm:$0xf0] }
  0x48   : > { %1292 = vmatpush.bf16.msrb.mxu1 %v3862_v1  ;;  %v3793_v1 = vld [vmem:[%s6070_s1 + $0x5c] sm:$0xf] }
  0x49   : > { %1321 = vmatpush.bf16.msrb.mxu2 %v3870_v2  ;;  %v3030_v2 = vld [vmem:[%s6070_s1 + $0x7c] sm:$0xf0] }
  0x4a   : > { %1350 = vmatpush.bf16.msrb.mxu3 %v3878_v3  ;;  %1157 = vmatmul.bf16.gmra.mxu0 %v3013_v4  ;;  %v3036_v3 = vld [vmem:[%s6070_s1 + $0x60] sm:$0xf]  ;;  %v3798_v4 = vld [vmem:[%s6070_s1 + $0x80] sm:$0xf0] }
  0x4b   : > { %1186 = vmatmul.bf16.gmra.mxu1 %v3017_v5  ;;  %1264 = vmatpush.bf16.msrb.mxu0 %v3853_v8  ;;  %v3794_v5 = vld [vmem:[%s6070_s1 + $0x64] sm:$0xf]  ;;  %v3029_v8 = vor.u32 %v3797_v0, %v3028_v63 }
  0x4c   : > { %1215 = vmatmul.bf16.gmra.mxu2 %v3021_v6  ;;  %1293 = vmatpush.bf16.msrb.mxu1 %v3861_v9  ;;  %v3038_v6 = vld [vmem:[%s6070_s1 + $0x84] sm:$0xf0]  ;;  %v3033_v9 = vor.u32 %v3793_v1, %v3030_v2  ;;  %v3080_v1 = vld [vmem:[%s6070_s1 + $0xb0] sm:$0xf]  ;;  %v3808_v2 = vld [vmem:[%s6070_s1 + $0xd0] sm:$0xf0] }
  0x4d   : > { %1244 = vmatmul.bf16.gmra.mxu3 %v3025_v7  ;;  %1322 = vmatpush.bf16.msrb.mxu2 %v3869_v10  ;;  %v3886_v7 = vld [vmem:[%s4171_s25 + $0x220] sm:$0xff]  ;;  %v3037_v10 = vor.u32 %v3798_v4, %v3036_v3 }
  0x4e   : > { %1351 = vmatpush.bf16.msrb.mxu3 %v3877_v11  ;;  %v3041_v11 = vor.u32 %v3794_v5, %v3038_v6  ;;  %v521_v5 = vld [vmem:[%s6071_s2 + $0x20] sm:$0xff] }
  0x4f   : > { %1265 = vmatpush.bf16.msrb.mxu0 %v3852_v12  ;;  %v3885_v12 = vld [vmem:[%s4171_s25 + $0x218] sm:$0xff] }
  0x50   : > { %1294 = vmatpush.bf16.msrb.mxu1 %v3860_v13  ;;  %v3884_v13 = vld [vmem:[%s4171_s25 + $0x210] sm:$0xff] }
  0x51   : > { %1323 = vmatpush.bf16.msrb.mxu2 %v3868_v14  ;;  %v3883_v14 = vld [vmem:[%s4171_s25 + $0x208] sm:$0xff] }
  0x52   : > { %1352 = vmatpush.bf16.msrb.mxu3 %v3876_v15  ;;  %v3064_v15 = vld [vmem:[%s6070_s1 + $0xa0] sm:$0xf] }
  0x53   : > { %1266 = vmatpush.bf16.msrb.mxu0 %v3851_v16  ;;  %v3806_v16 = vld [vmem:[%s6070_s1 + $0xc0] sm:$0xf0] }
  0x54   : > { %1295 = vmatpush.bf16.msrb.mxu1 %v3859_v17  ;;  %v3802_v17 = vld [vmem:[%s6070_s1 + $0xa4] sm:$0xf]  ;;  %v3065_v23 = vor.u32 %v3806_v16, %v3064_v15  ;;  %v522_v15 = vld [vmem:[%s6071_s2 + $0x28] sm:$0xff] }
  0x55   : > { %1324 = vmatpush.bf16.msrb.mxu2 %v3867_v19  ;;  %v3072_v19 = vld [vmem:[%s6070_s1 + $0xa8] sm:$0xf]  ;;  %v3069_v24 = vor.u32 %v3802_v17, %v3066_v18 }
  0x56   : > { %1353 = vmatpush.bf16.msrb.mxu3 %v3875_v20  ;;  %v3807_v20 = vld [vmem:[%s6070_s1 + $0xc8] sm:$0xf0] }
  0x57   : > { %1267 = vmatpush.bf16.msrb.mxu0 %v3850_v28  ;;  %v3073_v26 = vor.u32 %v3807_v20, %v3072_v19  ;;  %v3100_v28 = vld [vmem:[%s6070_s1 + $0xe8] sm:$0xf] }
  0x58   : > { %1296 = vmatpush.bf16.msrb.mxu1 %v3858_v29  ;;  %v3815_v29 = vld [vmem:[%s6070_s1 + $0x108] sm:$0xf0] }
  0x59   : > { %1325 = vmatpush.bf16.msrb.mxu2 %v3866_v30  ;;  %v3811_v30 = vld [vmem:[%s6070_s1 + $0xec] sm:$0xf]  ;;  %v3101_v36 = vor.u32 %v3815_v29, %v3100_v28 }
  0x5a   : > { %1354 = vmatpush.bf16.msrb.mxu3 %v3874_v31  ;;  %1162 = vmatmul.bf16.gmra.mxu0 %v3049_v32  ;;  %v3102_v31 = vld [vmem:[%s6070_s1 + $0x10c] sm:$0xf0] }
  0x5b   : > { %1191 = vmatmul.bf16.gmra.mxu1 %v3053_v33  ;;  %1376 = vmatpush.bf16.msra.mxu0 %v3889_v60  ;;  %v3108_v32 = vld [vmem:[%s6070_s1 + $0xf0] sm:$0xf]  ;;  %v3816_v33 = vld [vmem:[%s6070_s1 + $0x110] sm:$0xf0]  ;;  %v3105_v37 = vor.u32 %v3811_v30, %v3102_v31  ;;  %v517_v30 = vld [vmem:[%s6071_s2] sm:$0xff] }
  0x5c   : > { %1220 = vmatmul.bf16.gmra.mxu2 %v3057_v34  ;;  %3890 = vmatpush.bf16.msra.mxu1 %v3889_v60  ;;  %v3812_v34 = vld [vmem:[%s6070_s1 + $0xf4] sm:$0xf]  ;;  %v3109_v38 = vor.u32 %v3816_v33, %v3108_v32  ;;  %v520_v60 = vld [vmem:[%s6071_s2 + $0x18] sm:$0xff] }
  0x5d   : > { %1249 = vmatmul.bf16.gmra.mxu3 %v3061_v35  ;;  %v3110_v35 = vld [vmem:[%s6070_s1 + $0x114] sm:$0xf0] }
  0x5e   : > { %v3113_v39 = vor.u32 %v3812_v34, %v3110_v35  ;;  %v524_v34 = vld [vmem:[%s6071_s2 + $0x38] sm:$0xff] }
  0x5f   : > { %1377 = vmatpush.bf16.msra.mxu0 %v3888_v61 }
  0x60   : > { %3891 = vmatpush.bf16.msra.mxu1 %v3888_v61 }
  0x63   : > { %1378 = vmatpush.bf16.msra.mxu0 %v3887_v62 }
  0x64   : > { %3892 = vmatpush.bf16.msra.mxu1 %v3887_v62 }
  0x67   : > { %1379 = vmatpush.bf16.msra.mxu0 %v3886_v7 }
  0x68   : > { %3893 = vmatpush.bf16.msra.mxu1 %v3886_v7  ;;  %v3081_v7 = vor.u32 %v3808_v2, %v3080_v1 }
  0x6a   : > { %1167 = vmatmul.bf16.gmra.mxu0 %v3085_v44  ;;  %v3009_v44 = vor.u32 %v3790_v41, %v3008_v40 }
  0x6b   : > { %1196 = vmatmul.bf16.gmra.mxu1 %v3089_v45  ;;  %1380 = vmatpush.bf16.msra.mxu0 %v3885_v12  ;;  %v3117_v45 = vor.u32 %v3817_v43, %v3116_v42 }
  0x6c   : > { %1225 = vmatmul.bf16.gmra.mxu2 %v3093_v46  ;;  %3894 = vmatpush.bf16.msra.mxu1 %v3885_v12 }
  0x6d   : > { %1254 = vmatmul.bf16.gmra.mxu3 %v3097_v47 }
  0x6f   : > { %1381 = vmatpush.bf16.msra.mxu0 %v3884_v13 }
  0x70   : > { %3895 = vmatpush.bf16.msra.mxu1 %v3884_v13 }
  0x73   : > { %1382 = vmatpush.bf16.msra.mxu0 %v3883_v14 }
  0x74   : > { %3896 = vmatpush.bf16.msra.mxu1 %v3883_v14 }
  0x77   : > { %1383 = vmatpush.bf16.msra.mxu0 %v3882_v25 }
  0x78   : > { %3897 = vmatpush.bf16.msra.mxu1 %v3882_v25 }
  0x7a   : > { %1268 = vmatmul.bf16.vlgmr.msrb.gmra.mxu0 %v2993_v56  ;;  %v3045_v56 = vor.u32 %v3799_v53, %v3044_v52 }
  0x7b   : > { %1297 = vmatmul.bf16.vlgmr.msrb.gmra.mxu1 %v2997_v57 }
  0x7c   : > { %1326 = vmatmul.bf16.vlgmr.msrb.gmra.mxu2 %v3001_v58 }
  0x7d   : > { %1355 = vmatmul.bf16.vlgmr.msrb.gmra.mxu3 %v3005_v59 }
  0x8a   : > { %1273 = vmatmul.bf16.gmra.mxu0 %v3029_v8 }
  0x8b   : > { %1302 = vmatmul.bf16.gmra.mxu1 %v3033_v9 }
  0x8c   : > { %1331 = vmatmul.bf16.gmra.mxu2 %v3037_v10 }
  0x8d   : > { %1360 = vmatmul.bf16.gmra.mxu3 %v3041_v11 }
  0x9a   : > { %1278 = vmatmul.bf16.gmra.mxu0 %v3065_v23  ;;  %v523_v23 = vld [vmem:[%s6071_s2 + $0x30] sm:$0xff] }
  0x9b   : > { %1307 = vmatmul.bf16.gmra.mxu1 %v3069_v24 }
  0x9c   : > { %1336 = vmatmul.bf16.gmra.mxu2 %v3073_v26 }
  0x9d   : > { %1365 = vmatmul.bf16.gmra.mxu3 %v3077_v27 }
  0xaa   : > { %1283 = vmatmul.bf16.gmra.mxu0 %v3101_v36 }
  0xab   : > { %1312 = vmatmul.bf16.gmra.mxu1 %v3105_v37 }
  0xac   : > { %1341 = vmatmul.bf16.gmra.mxu2 %v3109_v38 }
  0xad   : > { %1370 = vmatmul.bf16.gmra.mxu3 %v3113_v39 }
  0xb7   : > { %v1153_v46 = vpop.f32.mrf.mxu0 }
  0xb8   : > { %v1182_v47 = vpop.f32.mrf.mxu1  ;;  %v1154_v33 = vadd.f32 %v1153_v46, %v517_v30 }
  0xba   : > { %1384 = vmatmul.bf16.vlgmr.msra.gmra.mxu0 %v3009_v44  ;;  %v1183_v40 = vadd.f32 %v1182_v47, %v1154_v33 }
  0xbb   : > { %1399 = vmatmul.bf16.vlgmr.msra.gmra.mxu1 %v3117_v45 }
  0xbf   : > { %v1211_v48 = vpop.f32.mrf.mxu2  ;;  %v4449_v50 = vpop.f32.mrf.mxu0 }
  0xc0   : > { %v1240_v49 = vpop.f32.mrf.mxu3  ;;  %v4451_v51 = vpop.f32.mrf.mxu1  ;;  %v1212_v43 = vadd.f32 %v1211_v48, %v1183_v40 }
  0xc2   : > { %v1241_v45 = vadd.f32 %v1240_v49, %v1212_v43 }
  0xc7   : > { %v4459_v54 = vpop.f32.mrf.mxu2  ;;  %v1158_v57 = vpop.f32.mrf.mxu0 }
  0xc8   : > { %v4461_v55 = vpop.f32.mrf.mxu3  ;;  %v4463_v58 = vpop.f32.mrf.mxu1 }
  0xca   : > { %1389 = vmatmul.bf16.gmra.mxu0 %v3045_v56 }
  0xcf   : > { %v4465_v59 = vpop.f32.mrf.mxu2  ;;  %v1160_v62 = vpop.f32.mrf.mxu0 }
  0xd0   : > { %v4470_v61 = vpop.f32.mrf.mxu3  ;;  %v1189_v63 = vpop.f32.mrf.mxu1  ;;  %v1161_v0 = vadd.f32 %v1160_v62, %v520_v60  ;;  %v519_v62 = vld [vmem:[%s6071_s2 + $0x10] sm:$0xff] }
  0xd2   : > { %v1190_v3 = vadd.f32 %v1189_v63, %v1161_v0  ;;  %v1159_v0 = vadd.f32 %v1158_v57, %v519_v62 }
  0xd7   : > { %v1218_v4 = vpop.f32.mrf.mxu2  ;;  %v1163_v9 = vpop.f32.mrf.mxu0 }
  0xd8   : > { %v1247_v6 = vpop.f32.mrf.mxu3  ;;  %v1219_v8 = vadd.f32 %v1218_v4, %v1190_v3  ;;  %v1192_v10 = vpop.f32.mrf.mxu1  ;;  %v1164_v11 = vadd.f32 %v1163_v9, %v521_v5  ;;  %v1188_v4 = vadd.f32 %v4463_v58, %v1159_v0 }
  0xda   : > { %v4481_v12 = vadd.f32 %v1247_v6, %v1219_v8  ;;  %1394 = vmatmul.bf16.gmra.mxu0 %v3081_v7  ;;  %v1193_v13 = vadd.f32 %v1192_v10, %v1164_v11  ;;  %v1217_v48 = vadd.f32 %v4465_v59, %v1188_v4 }
  0xdc   : > { %v1246_v49 = vadd.f32 %v4470_v61, %v1217_v48 }
  0xdf   : > { %v1221_v14 = vpop.f32.mrf.mxu2  ;;  %v1165_v18 = vpop.f32.mrf.mxu0 }
  0xe0   : > { %v1250_v16 = vpop.f32.mrf.mxu3  ;;  %v1222_v17 = vadd.f32 %v1221_v14, %v1193_v13  ;;  %v1194_v19 = vpop.f32.mrf.mxu1  ;;  %v1166_v20 = vadd.f32 %v1165_v18, %v522_v15 }
  0xe2   : > { %v1251_v21 = vadd.f32 %v1250_v16, %v1222_v17  ;;  %v1195_v22 = vadd.f32 %v1194_v19, %v1166_v20 }
  0xe7   : > { %v1223_v24 = vpop.f32.mrf.mxu2  ;;  %v1168_v27 = vpop.f32.mrf.mxu0 }
  0xe8   : > { %v1252_v25 = vpop.f32.mrf.mxu3  ;;  %v1224_v26 = vadd.f32 %v1223_v24, %v1195_v22  ;;  %v1197_v28 = vpop.f32.mrf.mxu1  ;;  %v1169_v29 = vadd.f32 %v1168_v27, %v523_v23  ;;  %v518_v23 = vld [vmem:[%s6071_s2 + $0x8] sm:$0xff] }
  0xe9   : > { %v1156_v27 = vadd.f32 %v4449_v50, %v518_v23 }
  0xea   : > { %v4492_v31 = vadd.f32 %v1252_v25, %v1224_v26  ;;  %v1198_v32 = vadd.f32 %v1197_v28, %v1169_v29 }
  0xeb   : > { %v1185_v28 = vadd.f32 %v4451_v51, %v1156_v27 }
  0xed   : > { %v1214_v29 = vadd.f32 %v4459_v54, %v1185_v28  ;;  %v514_v54 = vlaneseq }
  0xef   : > { %v1226_v35 = vpop.f32.mrf.mxu2  ;;  %v1170_v38 = vpop.f32.mrf.mxu0 }
  0xf0   : > { %v1255_v36 = vpop.f32.mrf.mxu3  ;;  %v1227_v37 = vadd.f32 %v1226_v35, %v1198_v32  ;;  %v1199_v39 = vpop.f32.mrf.mxu1  ;;  %v1171_v41 = vadd.f32 %v1170_v38, %v524_v34 }
  0xf2   : > { %v1256_v42 = vadd.f32 %v1255_v36, %v1227_v37  ;;  %v1200_v44 = vadd.f32 %v1199_v39, %v1171_v41  ;;  %v1243_v37 = vadd.f32 %v4461_v55, %v1214_v29 }
  0xf7   : > { %v1228_v52 = vpop.f32.mrf.mxu2  ;;  %v1269_v56 = vpop.f32.mrf.mxu0 }
  0xf8   : > { %v1257_v53 = vpop.f32.mrf.mxu3  ;;  %v1298_v60 = vpop.f32.mrf.mxu1  ;;  %v1270_v46 = vadd.f32 %v1269_v56, %v1241_v45  ;;  %v1229_v30 = vadd.f32 %v1228_v52, %v1200_v44 }
  0xfa   : > { %v1299_v63 = vadd.f32 %v1298_v60, %v1270_v46  ;;  %v1258_v38 = vadd.f32 %v1257_v53, %v1229_v30  ;;  %v4538_v53 = vand.u32 127, %v514_v54 }
  0xfc   : > { %vm516_vm0 = vcmp.lt.s32.totalorder %v4538_v53, 100  ;;  %v3516_v53 = vld [vmem:[%s6074_s5 + $0x5c0] sm:$0x3] }
  0xff   : > { %v1327_v1 = vpop.f32.mrf.mxu2  ;;  %v1271_v3 = vpop.f32.mrf.mxu0 }
 0x100   : > { %v1356_v2 = vpop.f32.mrf.mxu3  ;;  %v1300_v47 = vpop.f32.mrf.mxu1  ;;  %v1272_v39 = vadd.f32 %v1271_v3, %v1243_v37  ;;  %v1328_v43 = vadd.f32 %v1327_v1, %v1299_v63 }
 0x102   : > { %v1301_v51 = vadd.f32 %v1300_v47, %v1272_v39  ;;  %v1357_v44 = vadd.f32 %v1356_v2, %v1328_v43 }
 0x107   : > { %v1329_v5 = vpop.f32.mrf.mxu2  ;;  %v1274_v7 = vpop.f32.mrf.mxu0 }
 0x108   : > { %v1358_v6 = vpop.f32.mrf.mxu3  ;;  %v1303_v8 = vpop.f32.mrf.mxu1  ;;  %v1275_v9 = vadd.f32 %v1274_v7, %v1246_v49  ;;  %v1330_v52 = vadd.f32 %v1329_v5, %v1301_v51  ;;  %v1421_v51 = vld [vmem:[%s6072_s3] sm:$0xff] }
 0x10a   : > { %v4503_v10 = vadd.f32 %v1303_v8, %v1275_v9  ;;  %v1359_v3 = vadd.f32 %v1358_v6, %v1330_v52  ;;  %v1422_v52 = vld [vmem:[%s6072_s3 + $0x8] sm:$0xff] }
 0x10f   : > { %v4505_v11 = vpop.f32.mrf.mxu2  ;;  %v1276_v13 = vpop.f32.mrf.mxu0 }
 0x110   : > { %v4507_v57 = vpop.f32.mrf.mxu3  ;;  %v4509_v14 = vpop.f32.mrf.mxu1  ;;  %v1277_v9 = vadd.f32 %v1276_v13, %v4481_v12  ;;  %v1333_v12 = vadd.f32 %v4505_v11, %v4503_v10 }
 0x112   : > { %v1362_v27 = vadd.f32 %v4507_v57, %v1333_v12  ;;  %v3497_v12 = vld [vmem:[%s6074_s5 + $0x528] sm:$0xff] }
 0x117   : > { %v4511_v15 = vpop.f32.mrf.mxu2  ;;  %v1279_v59 = vpop.f32.mrf.mxu0 }
 0x118   : > { %v4513_v58 = vpop.f32.mrf.mxu3  ;;  %v1308_v61 = vpop.f32.mrf.mxu1  ;;  %v1280_v16 = vadd.f32 %v1279_v59, %v1251_v21 }
 0x11a   : > { %v4515_v17 = vadd.f32 %v1308_v61, %v1280_v16 }
 0x11f   : > { %v4517_v18 = vpop.f32.mrf.mxu2  ;;  %v4521_v20 = vpop.f32.mrf.mxu0 }
 0x120   : > { %v4519_v19 = vpop.f32.mrf.mxu3  ;;  %v4523_v22 = vpop.f32.mrf.mxu1  ;;  %v1338_v57 = vadd.f32 %v4517_v18, %v4515_v17 }
 0x122   : > { %v1367_v37 = vadd.f32 %v4519_v19, %v1338_v57  ;;  %v3468_v57 = vld [vmem:[%s6074_s5 + $0x440] sm:$0xff] }
 0x127   : > { %v4528_v24 = vpop.f32.mrf.mxu2  ;;  %v1284_v26 = vpop.f32.mrf.mxu0 }
 0x128   : > { %v4530_v25 = vpop.f32.mrf.mxu3  ;;  %v1313_v21 = vpop.f32.mrf.mxu1  ;;  %v1285_v35 = vadd.f32 %v1284_v26, %v1256_v42 }
 0x12a   : > { %v1314_v40 = vadd.f32 %v1313_v21, %v1285_v35  ;;  %v1306_v21 = vadd.f32 %v4509_v14, %v1277_v9 }
 0x12c   : > { %v1335_v28 = vadd.f32 %v4511_v15, %v1306_v21 }
 0x12e   : > { %v1364_v10 = vadd.f32 %v4513_v58, %v1335_v28  ;;  %v3420_v28 = vld [vmem:[%s6072_s3 + $0x20] sm:$0xff] }
 0x12f   : > { %v1342_v32 = vpop.f32.mrf.mxu2  ;;  %v1286_v33 = vpop.f32.mrf.mxu0 }
 0x130   : > { %v1315_v34 = vpop.f32.mrf.mxu1  ;;  %v1371_v36 = vpop.f32.mrf.mxu3  ;;  %v1287_v41 = vadd.f32 %v1286_v33, %v1258_v38  ;;  %v1343_v45 = vadd.f32 %v1342_v32, %v1314_v40 }
 0x132   : > { %v1316_v46 = vadd.f32 %v1315_v34, %v1287_v41  ;;  %v1372_v62 = vadd.f32 %v1371_v36, %v1343_v45  ;;  %v1282_v34 = vadd.f32 %v4521_v20, %v4492_v31 }
 0x134   : > { %v1311_v58 = vadd.f32 %v4523_v22, %v1282_v34 }
 0x136   : > { %v1340_v38 = vadd.f32 %v4528_v24, %v1311_v58 }
 0x137   : > { %v1344_v56 = vpop.f32.mrf.mxu2  ;;  %v1385_v50 = vpop.f32.mrf.mxu0 }
 0x138   : > { %v1400_v60 = vpop.f32.mrf.mxu1  ;;  %v1345_v0 = vadd.f32 %v1344_v56, %v1316_v46  ;;  %v1373_v42 = vpop.f32.mrf.mxu3  ;;  %v4536_v4 = vadd.f32 %v1385_v50, %v1357_v44  ;;  %v1369_v20 = vadd.f32 %v4530_v25, %v1340_v38  ;;  %v3460_v38 = vld [vmem:[%s6074_s5 + $0x400] sm:$0xff] }
 0x139   : > { %v1401_v55 = vadd.f32 %v1400_v60, %v1372_v62 }
 0x13a   : > { %v1374_v48 = vadd.f32 %v1373_v42, %v1345_v0  ;;  %v1405_v49 = vmax.f32 %v4536_v4, 0.0 }
 0x13b   : > { %v1411_v7 = vmax.f32 %v1401_v55, 0.0 }
 0x13c   : > { %v1413_v59 = vsel %vm516_vm0, %v1405_v49, 0.0 }
 0x13d   : > { %v1419_v6 = vsel %vm516_vm0, %v1411_v7, 0.0 }
 0x13f   : > { %v1387_v63 = vpop.f32.mrf.mxu0 }
 0x140   : > { %v1402_v1 = vpop.f32.mrf.mxu1  ;;  %v1388_v47 = vadd.f32 %v1387_v63, %v1359_v3  ;;  %v3508_v3 = vld [vmem:[%s6074_s5 + $0x580] sm:$0xff]  ;;  %v3521_v63 = vld [vmem:[%s6074_s5 + $0x5e8] sm:$0x3] }
 0x141   : > { %v1403_v8 = vadd.f32 %v1402_v1, %v1374_v48  ;;  %3534 = vmatpush.msk.msrb.mxu0 %vm1835_vm2, %v3521_v63  ;;  %v3462_v63 = vld [vmem:[%s6074_s5 + $0x410] sm:$0xff] }
 0x142   : > { %v1406_v2 = vmax.f32 %v1388_v47, 0.0 }
 0x143   : > { %v1412_v5 = vmax.f32 %v1403_v8, 0.0 }
 0x144   : > { %v1414_v61 = vsel %vm516_vm0, %v1406_v2, 0.0 }
 0x145   : > { %v1420_v16 = vsel %vm516_vm0, %v1412_v5, 0.0  ;;  %3410 = vmatpush.msk.msra.mxu2 %vm516_vm0, %v1412_v5  ;;  %v3951_v26 = vpack.i.bf16 %v1413_v59, %v1414_v61  ;;  %v3505_v5 = vld [vmem:[%s6074_s5 + $0x568] sm:$0xff]  ;;  %v3406_v61 = vld [vmem:[%s6072_s3 + $0x10] sm:$0xff] }
 0x146   : > { %v3946_v23 = vpack.i.bf16 %v1419_v6, %v1420_v16  ;;  %v3492_v16 = vld [vmem:[%s6074_s5 + $0x500] sm:$0xff] }
 0x147   : > { %3411 = vmatpush.msk.msra.mxu2 %vm516_vm0, %v1411_v7  ;;  %v1390_v13 = vpop.f32.mrf.mxu0  ;;  %3952 = vrot.lane.b32.xlu2 %v3951_v26, %s4066_s28  ;;  %v3513_v7 = vld [vmem:[%s6074_s5 + $0x5a8] sm:$0xff] }
 0x148   : > { %3947 = vrot.lane.b32.xlu1 %v3946_v23, %s4065_s27  ;;  %3942 = vrot.lane.b32.xlu0 %v3946_v23, %s4066_s28  ;;  %v1391_v29 = vadd.f32 %v1390_v13, %v1362_v27  ;;  %v3484_v13 = vld [vmem:[%s6074_s5 + $0x4c0] sm:$0xff] }
 0x149   : > { %1965 = vmatpush.msrb.mxu0 %v3513_v7  ;;  %v3438_v7 = vld [vmem:[%s6074_s5 + $0x350] sm:$0xff] }
 0x14a   : > { %v1407_v30 = vmax.f32 %v1391_v29, 0.0  ;;  %v3489_v29 = vld [vmem:[%s6074_s5 + $0x4e8] sm:$0xff] }
 0x14b   : > { %1966 = vmatpush.msrb.mxu0 %v3505_v5  ;;  %v3433_v5 = vld [vmem:[%s6074_s5 + $0x328] sm:$0xff] }
 0x14c   : > { %v1415_v35 = vsel %vm516_vm0, %v1407_v30, 0.0 }
 0x14d   : > { %1967 = vmatpush.msrb.mxu0 %v3497_v12  ;;  %v1718_v12 = vld [vmem:[%s6074_s5 + $0x288] sm:$0xff] }
 0x14f   : > { %v1392_v11 = vpop.f32.mrf.mxu0  ;;  %1968 = vmatpush.msrb.mxu0 %v3489_v29  ;;  %v3495_v29 = vld [vmem:[%s6074_s5 + $0x518] sm:$0xff] }
 0x150   : > { %v1393_v32 = vadd.f32 %v1392_v11, %v1364_v10  ;;  %v3517_v11 = vld [vmem:[%s6074_s5 + $0x5c8] sm:$0x3] }
 0x152   : > { %v1408_v33 = vmax.f32 %v1393_v32, 0.0  ;;  %v3476_v32 = vld [vmem:[%s6074_s5 + $0x480] sm:$0xff] }
 0x154   : > { %v1416_v14 = vsel %vm516_vm0, %v1408_v33, 0.0 }
 0x155   : > { %v3956_v36 = vpack.i.bf16 %v1415_v35, %v1416_v14  ;;  %v3509_v35 = vld [vmem:[%s6074_s5 + $0x588] sm:$0xff] }
 0x157   : > { %v1395_v15 = vpop.f32.mrf.mxu0  ;;  %3957 = vrot.lane.b32.xlu1 %v3956_v36, %s4066_s28 }
 0x158   : > { %v1396_v31 = vadd.f32 %v1395_v15, %v1367_v37  ;;  %v3501_v15 = vld [vmem:[%s6074_s5 + $0x548] sm:$0xff] }
 0x159   : > { %v3473_v37 = vld [vmem:[%s6074_s5 + $0x468] sm:$0xff] }
 0x15a   : > { %v1409_v40 = vmax.f32 %v1396_v31, 0.0 }
 0x15c   : > { %v1417_v17 = vsel %vm516_vm0, %v1409_v40, 0.0 }
 0x15f   : > { %v1397_v39 = vpop.f32.mrf.mxu0  ;;  %3972 = vrot.lane.b32.xlu1 %v3946_v23, %s4067_s29 }
 0x160   : > { %v1398_v41 = vadd.f32 %v1397_v39, %v1369_v20  ;;  %v3493_v20 = vld [vmem:[%s6074_s5 + $0x508] sm:$0xff] }
 0x162   : > { %v1410_v43 = vmax.f32 %v1398_v41, 0.0  ;;  %v3465_v41 = vld [vmem:[%s6074_s5 + $0x428] sm:$0xff] }
 0x164   : > { %v1418_v18 = vsel %vm516_vm0, %v1410_v43, 0.0  ;;  %3412 = vmatpush.msk.msra.mxu2 %vm516_vm0, %v1410_v43  ;;  %v3485_v43 = vld [vmem:[%s6074_s5 + $0x4c8] sm:$0xff] }
 0x165   : > { %v3961_v19 = vpack.i.bf16 %v1417_v17, %v1418_v18  ;;  %v3452_v18 = vld [vmem:[%s6074_s5 + $0x3c0] sm:$0xff] }
 0x166   : > { %3413 = vmatpush.msk.msra.mxu2 %vm516_vm0, %v1409_v40  ;;  %v3421_v40 = vld [vmem:[%s6072_s3 + $0x28] sm:$0xff] }
 0x167   : > { %3962 = vrot.lane.b32.xlu0 %v3961_v19, %s4066_s28  ;;  %3992 = vrot.lane.b32.xlu1 %v3956_v36, %s4067_s29 }
 0x168   : > { %3977 = vrot.lane.b32.xlu2 %v3961_v19, %s4065_s27  ;;  %3414 = vmatpush.msk.msra.mxu2 %vm516_vm0, %v1408_v33  ;;  %v3481_v33 = vld [vmem:[%s6074_s5 + $0x4a8] sm:$0xff] }
 0x169   : > { %1969 = vmatpush.msrb.mxu0 %v3481_v33  ;;  %v3488_v33 = vld [vmem:[%s6074_s5 + $0x4e0] sm:$0xff] }
 0x16a   : > { %3415 = vmatpush.msk.msra.mxu2 %vm516_vm0, %v1407_v30 }
 0x16b   : > { %1970 = vmatpush.msrb.mxu0 %v3473_v37  ;;  %v3472_v37 = vld [vmem:[%s6074_s5 + $0x460] sm:$0xff] }
 0x16c   : > { %3416 = vmatpush.msk.msra.mxu2 %vm516_vm0, %v1406_v2  ;;  %v3500_v2 = vld [vmem:[%s6074_s5 + $0x540] sm:$0xff] }
 0x16d   : > { %1971 = vmatpush.msrb.mxu0 %v3465_v41  ;;  %v1670_v41 = vld [vmem:[%s6074_s5 + $0x108] sm:$0xff] }
 0x16e   : > { %3417 = vmatpush.msk.msra.mxu2 %vm516_vm0, %v1405_v49 }
 0x16f   : > { %3967 = vrot.lane.b32.xlu0 %v3956_v36, %s4065_s27  ;;  %3418 = vmatmul.msk.f32.vlgmr.msra.gmra.mxu2 %vm1458_vm1, %v1421_v51  ;;  %v3407_v36 = vld [vmem:[%s6072_s3 + $0x18] sm:$0xff]  ;;  %v3436_v51 = vld [vmem:[%s6074_s5 + $0x340] sm:$0xff] }
 0x170   : > { %3982 = vrot.lane.b32.xlu2 %v3951_v26, %s4065_s27  ;;  %3524 = vmatpush.msk.msrb.mxu2 %vm1835_vm2, %v3516_v53  ;;  %v3437_v53 = vld [vmem:[%s6074_s5 + $0x348] sm:$0xff]  ;;  %s4021_s27 = scalar_lea.hbm %s6078_s9, 2 }
 0x172   : > { %1865 = vmatpush.msrb.mxu2 %v3508_v3  ;;  %v3478_v3 = vld [vmem:[%s6074_s5 + $0x490] sm:$0xff] }
 0x174   : > { %1866 = vmatpush.msrb.mxu2 %v3500_v2  ;;  %v3430_v2 = vld [vmem:[%s6074_s5 + $0x310] sm:$0xff] }
 0x176   : > { %1867 = vmatpush.msrb.mxu2 %v3492_v16  ;;  %v3511_v16 = vld [vmem:[%s6074_s5 + $0x598] sm:$0xff] }
 0x177   : > { %3987 = vrot.lane.b32.xlu0 %v3961_v19, %s4067_s29  ;;  %3419 = vmatmul.msk.f32.gmra.mxu2 %vm1458_vm1, %v1422_v52  ;;  %v3457_v19 = vld [vmem:[%s6074_s5 + $0x3e8] sm:$0xff]  ;;  %v3502_v52 = vld [vmem:[%s6074_s5 + $0x550] sm:$0xff] }
 0x178   : > { %3997 = vrot.lane.b32.xlu2 %v3951_v26, %s4067_s29  ;;  %1868 = vmatpush.msrb.mxu2 %v3484_v13  ;;  %v3503_v13 = vld [vmem:[%s6074_s5 + $0x558] sm:$0xff]  ;;  %s2910_s29 = scalar_lea.hbm %s6078_s9, %s4139_s13 }
 0x179   : > { %1972 = vmatpush.msrb.mxu0 %v3457_v19  ;;  %v1662_v19 = vld [vmem:[%s6074_s5 + $0xc8] sm:$0xff]  ;;  %s2914_s22 = sshll.u32 %s2910_s29, 4  ;;  %s2915_s22 = int_to_ptr.hbm [resolvable:$true] %s2914_s22 }
 0x17a   : > { %1869 = vmatpush.msrb.mxu2 %v3476_v32  ;;  %v3487_v32 = vld [vmem:[%s6074_s5 + $0x4d8] sm:$0xff]  ;;  %s4015_s23 = sshra.s32 %s2915_s22, 4  ;;  %s4016_s23 = int_to_ptr.hbm [resolvable:$true] %s4015_s23 }
 0x17b   : > { %s4017_s25 = scalar_lea.hbm %s4016_s23, 1  ;;  %p4022_p0 = scmp.lt.s32.totalorder %s4016_s23, %s6078_s9 }
 0x17c   : > { %1870 = vmatpush.msrb.mxu2 %v3468_v57  ;;  %v3482_v57 = vld [vmem:[%s6074_s5 + $0x4b0] sm:$0xff]  ;;  %p4018_p11 = scmp.ne.s32.totalorder %s4016_s23, %s4017_s25  ;;  %p4023_p1 = scmp.lt.s32.totalorder %s4021_s27, %s4017_s25 }
 0x17e   : > { %1871 = vmatpush.msrb.mxu2 %v3460_v38  ;;  %v3474_v38 = vld [vmem:[%s6074_s5 + $0x470] sm:$0xff]  ;;  %p4019_p12 = pnand %p4018_p11, %p4156_p5  ;;  %p4024_p2 = por %p4023_p1, %p4022_p0 }
 0x180   : > { %1872 = vmatpush.msrb.mxu2 %v3452_v18  ;;  %v3458_v18 = vld [vmem:[%s6074_s5 + $0x3f0] sm:$0xff]  ;;  %p4020_p13 = pneg %p4019_p12 }
 0x182   : > { %p4025_p3 = pnand %p4024_p2, %p4020_p13 }
 0x1a1   : > { %v3953_v25 = vpop.permute.xlu2 %3952 }
 0x1a2   : > { %v3954_v47 = vunpack.i.l.bf16 %v3953_v25  ;;  %v3955_v59 = vunpack.i.h.bf16 %v3953_v25  ;;  %v3424_v25 = vld [vmem:[%s6072_s3 + $0x30] sm:$0xff] }
 0x1ba   : > { %v3948_v22 = vpop.permute.xlu1 %3947  ;;  %v3943_v24 = vpop.permute.xlu0 %3942 }
 0x1bb   : > { %v3949_v45 = vunpack.i.l.bf16 %v3948_v22  ;;  %v3944_v56 = vunpack.i.l.bf16 %v3943_v24  ;;  %v3950_v50 = vunpack.i.h.bf16 %v3948_v22  ;;  %v3945_v60 = vunpack.i.h.bf16 %v3943_v24  ;;  %v3477_v22 = vld [vmem:[%s6074_s5 + $0x488] sm:$0xff] }
 0x1bd   : > { %1473 = vmatpush.msrb.mxu1 %v3944_v56  ;;  %1558 = vmatpush.msra.mxu3 %v3949_v45  ;;  %v3444_v45 = vld [vmem:[%s6074_s5 + $0x380] sm:$0xff]  ;;  %v3518_v56 = vld [vmem:[%s6074_s5 + $0x5d0] sm:$0x3] }
 0x1be   : > { %1873 = vmatpush.msrb.mxu2 %v3444_v45  ;;  %v1654_v45 = vld [vmem:[%s6074_s5 + $0x88] sm:$0xff] }
 0x1bf   : > { %1474 = vmatpush.msrb.mxu1 %v3945_v60  ;;  %1559 = vmatpush.msra.mxu3 %v3950_v50  ;;  %v3469_v50 = vld [vmem:[%s6074_s5 + $0x448] sm:$0xff] }
 0x1c0   : > { %v3449_v60 = vld [vmem:[%s6074_s5 + $0x3a8] sm:$0xff]  ;;  %1874 = vmatpush.msrb.mxu2 %v3436_v51 }
 0x1c1   : > { %1973 = vmatpush.msrb.mxu0 %v3449_v60  ;;  %v3442_v60 = vld [vmem:[%s6074_s5 + $0x370] sm:$0xff]  ;;  %v1646_v51 = vld [vmem:[%s6074_s5 + $0x48] sm:$0xff] }
 0x1c2   : > { %v3978_v46 = vpop.permute.xlu2 %3977 }
 0x1c3   : > { %v3979_v54 = vunpack.i.l.bf16 %v3978_v46  ;;  %v3980_v44 = vunpack.i.h.bf16 %v3978_v46  ;;  %v3510_v46 = vld [vmem:[%s6074_s5 + $0x590] sm:$0xff] }
 0x1c5   : > { %1560 = vmatpush.msra.mxu3 %v3979_v54  ;;  %v3461_v54 = vld [vmem:[%s6074_s5 + $0x408] sm:$0xff] }
 0x1c7   : > { %1561 = vmatpush.msra.mxu3 %v3980_v44  ;;  %v3441_v44 = vld [vmem:[%s6074_s5 + $0x368] sm:$0xff] }
 0x1c8   : > { %1974 = vmatpush.msrb.mxu0 %v3441_v44  ;;  %v3434_v44 = vld [vmem:[%s6074_s5 + $0x330] sm:$0xff] }
 0x1c9   : > { %v3958_v62 = vpop.permute.xlu1 %3957 }
 0x1ca   : > { %v3959_v55 = vunpack.i.l.bf16 %v3958_v62  ;;  %v3960_v48 = vunpack.i.h.bf16 %v3958_v62  ;;  %v3983_v9 = vpop.permute.xlu2 %3982  ;;  %v3453_v62 = vld [vmem:[%s6074_s5 + $0x3c8] sm:$0xff]  ;;  %1975 = vmatpush.msrb.mxu0 %v3433_v5 }
 0x1cb   : > { %v3984_v23 = vunpack.i.l.bf16 %v3983_v9  ;;  %v3985_v21 = vunpack.i.h.bf16 %v3983_v9  ;;  %v3519_v9 = vld [vmem:[%s6074_s5 + $0x5d8] sm:$0x3]  ;;  %v1730_v5 = vld [vmem:[%s6074_s5 + $0x2e8] sm:$0x3] }
 0x1d1   : > { %v3973_v1 = vpop.permute.xlu1 %3972 }
 0x1d2   : > { %v3974_v26 = vunpack.i.l.bf16 %v3973_v1  ;;  %v3975_v27 = vunpack.i.h.bf16 %v3973_v1  ;;  %v3998_v31 = vpop.permute.xlu2 %3997  ;;  %v3454_v1 = vld [vmem:[%s6074_s5 + $0x3d0] sm:$0xff] }
 0x1d3   : > { %v3999_v17 = vunpack.i.l.bf16 %v3998_v31  ;;  %v4000_v24 = vunpack.i.h.bf16 %v3998_v31  ;;  %v1678_v31 = vld [vmem:[%s6074_s5 + $0x148] sm:$0xff] }
 0x1d9   : > { %v3963_v0 = vpop.permute.xlu0 %3962  ;;  %v3993_v34 = vpop.permute.xlu1 %3992 }
 0x1da   : > { %v3964_v42 = vunpack.i.l.bf16 %v3963_v0  ;;  %v3965_v4 = vunpack.i.h.bf16 %v3963_v0  ;;  %v3994_v58 = vunpack.i.l.bf16 %v3993_v34  ;;  %v3995_v39 = vunpack.i.h.bf16 %v3993_v34  ;;  %v3494_v0 = vld [vmem:[%s6074_s5 + $0x510] sm:$0xff] }
 0x1db   : > { %v3490_v34 = vld [vmem:[%s6074_s5 + $0x4f0] sm:$0xff] }
 0x1dc   : > { %1475 = vmatpush.msrb.mxu1 %v3964_v42  ;;  %v3445_v42 = vld [vmem:[%s6074_s5 + $0x388] sm:$0xff] }
 0x1de   : > { %1476 = vmatpush.msrb.mxu1 %v3965_v4  ;;  %v3425_v4 = vld [vmem:[%s6072_s3 + $0x38] sm:$0xff] }
 0x1e0   : > { %1477 = vmatpush.msrb.mxu1 %v3959_v55  ;;  %v3486_v55 = vld [vmem:[%s6074_s5 + $0x4d0] sm:$0xff] }
 0x1e1   : > { %v3968_v49 = vpop.permute.xlu0 %3967 }
 0x1e2   : > { %v3969_v8 = vunpack.i.l.bf16 %v3968_v49  ;;  %1478 = vmatpush.msrb.mxu1 %v3960_v48  ;;  %v3970_v6 = vunpack.i.h.bf16 %v3968_v49  ;;  %v3470_v48 = vld [vmem:[%s6074_s5 + $0x450] sm:$0xff] }
 0x1e3   : > { %v3446_v49 = vld [vmem:[%s6074_s5 + $0x390] sm:$0xff] }
 0x1e4   : > { %1479 = vmatpush.msrb.mxu1 %v3954_v47  ;;  %1562 = vmatpush.msra.mxu3 %v3969_v8  ;;  %v3428_v47 = vld [vmem:[%s6074_s5 + $0x300] sm:$0xff]  ;;  %v3429_v8 = vld [vmem:[%s6074_s5 + $0x308] sm:$0xff] }
 0x1e5   : > { %1875 = vmatpush.msrb.mxu2 %v3428_v47  ;;  %v3523_v47 = vld [vmem:[%s6074_s5 + $0x5f8] sm:$0x3] }
 0x1e6   : > { %1480 = vmatpush.msrb.mxu1 %v3955_v59  ;;  %1563 = vmatpush.msra.mxu3 %v3970_v6  ;;  %v3520_v59 = vld [vmem:[%s6074_s5 + $0x5e0] sm:$0x3]  ;;  %v3522_v6 = vld [vmem:[%s6074_s5 + $0x5f0] sm:$0x3] }
 0x1e7   : > { %3408 = vmatmul.msk.f32.vlgmr.msrb.gmra.mxu1 %vm1458_vm1, %v3406_v61  ;;  %v1726_v61 = vld [vmem:[%s6074_s5 + $0x2c8] sm:$0x3]  ;;  %3530 = vmatpush.msk.msra.mxu2 %vm1835_vm2, %v3519_v9  ;;  %v3515_v9 = vld [vmem:[%s6074_s5 + $0x5b8] sm:$0xff] }
 0x1e8   : > { %1616 = vmatpush.msra.mxu1 %v3974_v26  ;;  %1564 = vmatpush.msra.mxu3 %v3984_v23  ;;  %v3512_v23 = vld [vmem:[%s6074_s5 + $0x5a0] sm:$0xff]  ;;  %v3514_v26 = vld [vmem:[%s6074_s5 + $0x5b0] sm:$0xff] }
 0x1e9   : > { %v3988_v10 = vpop.permute.xlu0 %3987  ;;  %3542 = vmatpush.msk.msra.mxu0 %vm1835_vm2, %v1726_v61  ;;  %1925 = vmatpush.msra.mxu2 %v3511_v16  ;;  %v1722_v61 = vld [vmem:[%s6074_s5 + $0x2a8] sm:$0xff]  ;;  %v3507_v16 = vld [vmem:[%s6074_s5 + $0x578] sm:$0xff] }
 0x1ea   : > { %v3989_v30 = vunpack.i.l.bf16 %v3988_v10  ;;  %1617 = vmatpush.msra.mxu1 %v3975_v27  ;;  %1565 = vmatpush.msra.mxu3 %v3985_v21  ;;  %v3990_v14 = vunpack.i.h.bf16 %v3988_v10  ;;  %v3504_v21 = vld [vmem:[%s6074_s5 + $0x560] sm:$0xff]  ;;  %v3506_v27 = vld [vmem:[%s6074_s5 + $0x570] sm:$0xff] }
 0x1eb   : > { %3422 = vmatmul.msk.f32.vlgmr.msra.gmra.mxu3 %vm1458_vm1, %v3420_v28  ;;  %v1710_v28 = vld [vmem:[%s6074_s5 + $0x248] sm:$0xff]  ;;  %2071 = vmatpush.msra.mxu0 %v1718_v12  ;;  %v3496_v10 = vld [vmem:[%s6074_s5 + $0x520] sm:$0xff] }
 0x1ec   : > { %1618 = vmatpush.msra.mxu1 %v3989_v30  ;;  %3526 = vmatpush.msk.msrb.mxu3 %vm1835_vm2, %v3517_v11  ;;  %v3498_v11 = vld [vmem:[%s6074_s5 + $0x530] sm:$0xff]  ;;  %v1702_v30 = vld [vmem:[%s6074_s5 + $0x208] sm:$0xff] }
 0x1ed   : > { %1926 = vmatpush.msra.mxu2 %v3503_v13  ;;  %2072 = vmatpush.msra.mxu0 %v1710_v28  ;;  %v1714_v12 = vld [vmem:[%s6074_s5 + $0x268] sm:$0xff]  ;;  %v3499_v13 = vld [vmem:[%s6074_s5 + $0x538] sm:$0xff] }
 0x1ee   : > { %1619 = vmatpush.msra.mxu1 %v3990_v14  ;;  %1885 = vmatpush.msrb.mxu3 %v3509_v35  ;;  %v1694_v35 = vld [vmem:[%s6074_s5 + $0x1c8] sm:$0xff]  ;;  %v3479_v14 = vld [vmem:[%s6074_s5 + $0x498] sm:$0xff] }
 0x1ef   : > { %3409 = vmatmul.msk.f32.gmra.mxu1 %vm1458_vm1, %v3407_v36  ;;  %1927 = vmatpush.msra.mxu2 %v3495_v29  ;;  %v3480_v36 = vld [vmem:[%s6074_s5 + $0x4a0] sm:$0xff]  ;;  %v1706_v28 = vld [vmem:[%s6074_s5 + $0x228] sm:$0xff]  ;;  %v3491_v29 = vld [vmem:[%s6074_s5 + $0x4f8] sm:$0xff] }
 0x1f0   : > { %1620 = vmatpush.msra.mxu1 %v3994_v58  ;;  %1886 = vmatpush.msrb.mxu3 %v3501_v15  ;;  %v1686_v15 = vld [vmem:[%s6074_s5 + $0x188] sm:$0xff]  ;;  %v3471_v58 = vld [vmem:[%s6074_s5 + $0x458] sm:$0xff] }
 0x1f1   : > { %2073 = vmatpush.msra.mxu0 %v1702_v30  ;;  %1928 = vmatpush.msra.mxu2 %v3487_v32  ;;  %v1698_v30 = vld [vmem:[%s6074_s5 + $0x1e8] sm:$0xff]  ;;  %v3483_v32 = vld [vmem:[%s6074_s5 + $0x4b8] sm:$0xff] }
 0x1f2   : > { %1621 = vmatpush.msra.mxu1 %v3995_v39  ;;  %1887 = vmatpush.msrb.mxu3 %v3493_v20  ;;  %v3463_v20 = vld [vmem:[%s6074_s5 + $0x418] sm:$0xff]  ;;  %v3464_v39 = vld [vmem:[%s6074_s5 + $0x420] sm:$0xff] }
 0x1f3   : > { %3423 = vmatmul.msk.f32.gmra.mxu3 %vm1458_vm1, %v3421_v40  ;;  %2074 = vmatpush.msra.mxu0 %v1694_v35  ;;  %v3466_v40 = vld [vmem:[%s6074_s5 + $0x430] sm:$0xff]  ;;  %v1690_v35 = vld [vmem:[%s6074_s5 + $0x1a8] sm:$0xff] }
 0x1f4   : > { %1622 = vmatpush.msra.mxu1 %v3999_v17  ;;  %1888 = vmatpush.msrb.mxu3 %v3485_v43  ;;  %v3455_v43 = vld [vmem:[%s6074_s5 + $0x3d8] sm:$0xff]  ;;  %v3456_v17 = vld [vmem:[%s6074_s5 + $0x3e0] sm:$0xff] }
 0x1f5   : > { %1929 = vmatpush.msra.mxu2 %v3479_v14  ;;  %2075 = vmatpush.msra.mxu0 %v1686_v15  ;;  %v3475_v14 = vld [vmem:[%s6074_s5 + $0x478] sm:$0xff]  ;;  %v1682_v15 = vld [vmem:[%s6074_s5 + $0x168] sm:$0xff] }
 0x1f6   : > { %1623 = vmatpush.msra.mxu1 %v4000_v24  ;;  %1889 = vmatpush.msrb.mxu3 %v3477_v22  ;;  %v3447_v22 = vld [vmem:[%s6074_s5 + $0x398] sm:$0xff]  ;;  %v3448_v24 = vld [vmem:[%s6074_s5 + $0x3a0] sm:$0xff] }
 0x1f7   : > { %3426 = vmatmul.msk.f32.vlgmr.msra.gmra.mxu1 %vm1458_vm1, %v3424_v25  ;;  %1930 = vmatpush.msra.mxu2 %v3471_v58  ;;  %v3450_v25 = vld [vmem:[%s6074_s5 + $0x3b0] sm:$0xff]  ;;  %v3467_v58 = vld [vmem:[%s6074_s5 + $0x438] sm:$0xff] }
 0x1f8   : > { %3528 = vmatpush.msk.msrb.mxu1 %vm1835_vm2, %v3518_v56  ;;  %1890 = vmatpush.msrb.mxu3 %v3469_v50  ;;  %v3439_v56 = vld [vmem:[%s6074_s5 + $0x358] sm:$0xff]  ;;  %v3440_v50 = vld [vmem:[%s6074_s5 + $0x360] sm:$0xff] }
 0x1f9   : > { %2076 = vmatpush.msra.mxu0 %v1678_v31  ;;  %1931 = vmatpush.msra.mxu2 %v3463_v20  ;;  %v1674_v31 = vld [vmem:[%s6074_s5 + $0x128] sm:$0xff]  ;;  %v3459_v20 = vld [vmem:[%s6074_s5 + $0x3f8] sm:$0xff] }
 0x1fa   : > { %1905 = vmatpush.msrb.mxu1 %v3510_v46  ;;  %1891 = vmatpush.msrb.mxu3 %v3461_v54  ;;  %v3431_v46 = vld [vmem:[%s6074_s5 + $0x318] sm:$0xff]  ;;  %v3432_v54 = vld [vmem:[%s6074_s5 + $0x320] sm:$0xff] }
 0x1fb   : > { %2077 = vmatpush.msra.mxu0 %v1670_v41  ;;  %1932 = vmatpush.msra.mxu2 %v3455_v43  ;;  %v1666_v41 = vld [vmem:[%s6074_s5 + $0xe8] sm:$0xff]  ;;  %v3451_v43 = vld [vmem:[%s6074_s5 + $0x3b8] sm:$0xff] }
 0x1fc   : > { %1906 = vmatpush.msrb.mxu1 %v3502_v52  ;;  %1892 = vmatpush.msrb.mxu3 %v3453_v62  ;;  %v1638_v52 = vld [vmem:[%s6074_s5 + $0x8] sm:$0xff] }
 0x1fd   : > { %2078 = vmatpush.msra.mxu0 %v1662_v19  ;;  %1933 = vmatpush.msra.mxu2 %v3447_v22  ;;  %v1658_v19 = vld [vmem:[%s6074_s5 + $0xa8] sm:$0xff]  ;;  %v3443_v22 = vld [vmem:[%s6074_s5 + $0x378] sm:$0xff] }
 0x1fe   : > { %1907 = vmatpush.msrb.mxu1 %v3494_v0  ;;  %1893 = vmatpush.msrb.mxu3 %v3445_v42  ;;  %v1511_v42 = vpop.f32.mrf.mxu2 }
 0x1ff   : > { %3427 = vmatmul.msk.f32.gmra.mxu1 %vm1458_vm1, %v3425_v4  ;;  %2079 = vmatpush.msra.mxu0 %v1654_v45  ;;  %v1650_v45 = vld [vmem:[%s6074_s5 + $0x68] sm:$0xff] }
 0x200   : > { %1908 = vmatpush.msrb.mxu1 %v3486_v55  ;;  %1894 = vmatpush.msrb.mxu3 %v3437_v53 }
 0x201   : > { %1934 = vmatpush.msra.mxu2 %v3439_v56  ;;  %2080 = vmatpush.msra.mxu0 %v1646_v51  ;;  %v3435_v56 = vld [vmem:[%s6074_s5 + $0x338] sm:$0xff]  ;;  %v1642_v51 = vld [vmem:[%s6074_s5 + $0x28] sm:$0xff] }
 0x202   : > { %1909 = vmatpush.msrb.mxu1 %v3478_v3  ;;  %1895 = vmatpush.msrb.mxu3 %v3429_v8  ;;  %v525_v3 = vld [vmem:[%s6073_s4] sm:$0xff] }
 0x203   : > { %1935 = vmatpush.msra.mxu2 %v3431_v46  ;;  %2081 = vmatpush.msra.mxu0 %v1638_v52  ;;  %v1725_v8 = vld [vmem:[%s6074_s5 + $0x2c0] sm:$0x3]  ;;  %v1728_v46 = vld [vmem:[%s6074_s5 + $0x2d8] sm:$0x3]  ;;  %v3645_v52 = vld [vmem:[%s6074_s5 + $0x8c8] sm:$0x3] }
 0x204   : > { %1910 = vmatpush.msrb.mxu1 %v3470_v48  ;;  %3532 = vmatpush.msk.msra.mxu3 %vm1835_vm2, %v3520_v59  ;;  %v1717_v59 = vld [vmem:[%s6074_s5 + $0x280] sm:$0xff] }
 0x206   : > { %1911 = vmatpush.msrb.mxu1 %v3462_v63  ;;  %1945 = vmatpush.msra.mxu3 %v3512_v23  ;;  %v1709_v23 = vld [vmem:[%s6074_s5 + $0x240] sm:$0xff] }
 0x208   : > { %1912 = vmatpush.msrb.mxu1 %v3454_v1  ;;  %1946 = vmatpush.msra.mxu3 %v3504_v21  ;;  %v1701_v21 = vld [vmem:[%s6074_s5 + $0x200] sm:$0xff] }
 0x20a   : > { %1913 = vmatpush.msrb.mxu1 %v3446_v49  ;;  %1947 = vmatpush.msra.mxu3 %v3496_v10  ;;  %v1693_v10 = vld [vmem:[%s6074_s5 + $0x1c0] sm:$0xff] }
 0x20c   : > { %1914 = vmatpush.msrb.mxu1 %v3438_v7  ;;  %1948 = vmatpush.msra.mxu3 %v3488_v33  ;;  %v1685_v33 = vld [vmem:[%s6074_s5 + $0x180] sm:$0xff] }
 0x20e   : > { %1915 = vmatpush.msrb.mxu1 %v3430_v2  ;;  %1949 = vmatpush.msra.mxu3 %v3480_v36  ;;  %v1727_v2 = vld [vmem:[%s6074_s5 + $0x2d0] sm:$0x3]  ;;  %v1677_v36 = vld [vmem:[%s6074_s5 + $0x140] sm:$0xff] }
 0x210   : > { %3536 = vmatpush.msk.msra.mxu1 %vm1835_vm2, %v3522_v6  ;;  %1950 = vmatpush.msra.mxu3 %v3472_v37  ;;  %v1719_v6 = vld [vmem:[%s6074_s5 + $0x290] sm:$0xff]  ;;  %v1669_v37 = vld [vmem:[%s6074_s5 + $0x100] sm:$0xff] }
 0x212   : > { %1985 = vmatpush.msra.mxu1 %v3514_v26  ;;  %1951 = vmatpush.msra.mxu3 %v3464_v39  ;;  %v1711_v26 = vld [vmem:[%s6074_s5 + $0x250] sm:$0xff]  ;;  %v1661_v39 = vld [vmem:[%s6074_s5 + $0xc0] sm:$0xff] }
 0x214   : > { %1986 = vmatpush.msra.mxu1 %v3506_v27  ;;  %1952 = vmatpush.msra.mxu3 %v3456_v17  ;;  %v1703_v27 = vld [vmem:[%s6074_s5 + $0x210] sm:$0xff]  ;;  %v1653_v17 = vld [vmem:[%s6074_s5 + $0x80] sm:$0xff] }
 0x216   : > { %1987 = vmatpush.msra.mxu1 %v3498_v11  ;;  %1953 = vmatpush.msra.mxu3 %v3448_v24  ;;  %v1695_v11 = vld [vmem:[%s6074_s5 + $0x1d0] sm:$0xff]  ;;  %v1645_v24 = vld [vmem:[%s6074_s5 + $0x40] sm:$0xff] }
 0x218   : > { %1988 = vmatpush.msra.mxu1 %v3490_v34  ;;  %1954 = vmatpush.msra.mxu3 %v3440_v50  ;;  %v1687_v34 = vld [vmem:[%s6074_s5 + $0x190] sm:$0xff]  ;;  %v1637_v50 = vld [vmem:[%s6074_s5] sm:$0xff] }
 0x21a   : > { %1989 = vmatpush.msra.mxu1 %v3482_v57  ;;  %1955 = vmatpush.msra.mxu3 %v3432_v54  ;;  %v1679_v57 = vld [vmem:[%s6074_s5 + $0x150] sm:$0xff]  ;;  %v1729_v54 = vld [vmem:[%s6074_s5 + $0x2e0] sm:$0x3] }
 0x21c   : > { %1990 = vmatpush.msra.mxu1 %v3474_v38  ;;  %v1671_v38 = vld [vmem:[%s6074_s5 + $0x110] sm:$0xff] }
 0x21e   : > { %1991 = vmatpush.msra.mxu1 %v3466_v40  ;;  %v1663_v40 = vld [vmem:[%s6074_s5 + $0xd0] sm:$0xff] }
 0x220   : > { %1992 = vmatpush.msra.mxu1 %v3458_v18  ;;  %v1655_v18 = vld [vmem:[%s6074_s5 + $0x90] sm:$0xff] }
 0x222   : > { %1993 = vmatpush.msra.mxu1 %v3450_v25  ;;  %v1647_v25 = vld [vmem:[%s6074_s5 + $0x50] sm:$0xff] }
 0x224   : > { %1994 = vmatpush.msra.mxu1 %v3442_v60  ;;  %v1639_v60 = vld [vmem:[%s6074_s5 + $0x10] sm:$0xff] }
 0x226   : > { %1995 = vmatpush.msra.mxu1 %v3434_v44  ;;  %v1731_v44 = vld [vmem:[%s6074_s5 + $0x2f0] sm:$0x3] }
 0x264   : > { %v1482_v62 = vpop.f32.mrf.mxu1 }
 0x265   : > { %v1512_v55 = vadd.f32 %v1511_v42, %v1482_v62  ;;  %v1720_v62 = vld [vmem:[%s6074_s5 + $0x298] sm:$0xff]  ;;  %v1721_v42 = vld [vmem:[%s6074_s5 + $0x2a0] sm:$0xff] }
 0x26c   : > { %v4925_v0 = vpop.f32.mrf.mxu1 }
 0x26e   : > { %v1567_v4 = vpop.f32.mrf.mxu3 }
 0x26f   : > { %v1573_v53 = vadd.f32 %v1567_v4, %v1512_v55  ;;  %v1723_v4 = vld [vmem:[%s6074_s5 + $0x2b0] sm:$0xff]  ;;  %v3637_v55 = vld [vmem:[%s6074_s5 + $0x888] sm:$0xff] }
 0x274   : > { %v1625_v48 = vpop.f32.mrf.mxu1 }
 0x275   : > { %v1631_v63 = vadd.f32 %v1625_v48, %v1573_v53  ;;  %v1712_v53 = vld [vmem:[%s6074_s5 + $0x258] sm:$0xff]  ;;  %v1715_v48 = vld [vmem:[%s6074_s5 + $0x270] sm:$0xff] }
 0x277   : > { %v1633_v1 = vadd.f32 %v1631_v63, %v525_v3  ;;  %v1713_v3 = vld [vmem:[%s6074_s5 + $0x260] sm:$0xff]  ;;  %v3629_v63 = vld [vmem:[%s6074_s5 + $0x848] sm:$0xff] }
 0x279   : > { %v4930_v49 = vmax.f32 %v1633_v1, 0.0  ;;  %v1704_v1 = vld [vmem:[%s6074_s5 + $0x218] sm:$0xff] }
 0x27b   : > { %v4933_v7 = vrot.slane %v4930_v49, 4 }
 0x27d   : > { %3525 = vmatmul.msk.f32.vlgmr.msrb.gmra.mxu2 %vm1832_vm3, %v4933_v7  ;;  %3527 = vmatmul.msk.f32.vlgmr.msrb.gmra.mxu3 %vm1832_vm3, %v4933_v7 }
 0x27e   : > { %3529 = vmatmul.msk.f32.vlgmr.msrb.gmra.mxu1 %vm1832_vm3, %v4933_v7  ;;  %3535 = vmatmul.msk.f32.vlgmr.msrb.gmra.mxu0 %vm1832_vm3, %v4933_v7 }
 0x27f   : > { %3538 = vmatpush.msk.msrb.mxu2 %vm1835_vm2, %v3523_v47  ;;  %3540 = vmatpush.msk.msrb.mxu3 %vm1835_vm2, %v1725_v8  ;;  %v1707_v47 = vld [vmem:[%s6074_s5 + $0x230] sm:$0xff]  ;;  %v3621_v8 = vld [vmem:[%s6074_s5 + $0x808] sm:$0xff] }
 0x280   : > { %3544 = vmatpush.msk.msrb.mxu1 %vm1835_vm2, %v1727_v2  ;;  %3550 = vmatpush.msk.msrb.mxu0 %vm1835_vm2, %v1730_v5  ;;  %v1696_v2 = vld [vmem:[%s6074_s5 + $0x1d8] sm:$0xff]  ;;  %v1697_v5 = vld [vmem:[%s6074_s5 + $0x1e0] sm:$0xff] }
 0x281   : > { %2005 = vmatpush.msrb.mxu2 %v3515_v9  ;;  %2051 = vmatpush.msrb.mxu3 %v1717_v59  ;;  %v1699_v9 = vld [vmem:[%s6074_s5 + $0x1f0] sm:$0xff]  ;;  %v3613_v59 = vld [vmem:[%s6074_s5 + $0x7c8] sm:$0xff] }
 0x282   : > { %2091 = vmatpush.msrb.mxu1 %v1719_v6  ;;  %2151 = vmatpush.msrb.mxu0 %v1722_v61  ;;  %v1688_v6 = vld [vmem:[%s6074_s5 + $0x198] sm:$0xff]  ;;  %v1689_v61 = vld [vmem:[%s6074_s5 + $0x1a0] sm:$0xff] }
 0x283   : > { %2006 = vmatpush.msrb.mxu2 %v3507_v16  ;;  %2052 = vmatpush.msrb.mxu3 %v1709_v23  ;;  %v1691_v16 = vld [vmem:[%s6074_s5 + $0x1b0] sm:$0xff]  ;;  %v3605_v23 = vld [vmem:[%s6074_s5 + $0x788] sm:$0xff] }
 0x284   : > { %2092 = vmatpush.msrb.mxu1 %v1711_v26  ;;  %2152 = vmatpush.msrb.mxu0 %v1714_v12  ;;  %v1514_v26 = vpop.f32.mrf.mxu2  ;;  %v1680_v12 = vld [vmem:[%s6074_s5 + $0x158] sm:$0xff] }
 0x285   : > { %2007 = vmatpush.msrb.mxu2 %v3499_v13  ;;  %2053 = vmatpush.msrb.mxu3 %v1701_v21  ;;  %v1681_v13 = vld [vmem:[%s6074_s5 + $0x160] sm:$0xff]  ;;  %v1683_v21 = vld [vmem:[%s6074_s5 + $0x170] sm:$0xff] }
 0x286   : > { %2093 = vmatpush.msrb.mxu1 %v1703_v27  ;;  %2153 = vmatpush.msrb.mxu0 %v1706_v28  ;;  %v3597_v27 = vld [vmem:[%s6074_s5 + $0x748] sm:$0xff]  ;;  %v1570_v28 = vpop.f32.mrf.mxu3 }
 0x287   : > { %3531 = vmatmul.msk.f32.vlgmr.msra.gmra.mxu2 %vm1832_vm3, %v4933_v7  ;;  %3533 = vmatmul.msk.f32.vlgmr.msra.gmra.mxu3 %vm1832_vm3, %v4933_v7 }
 0x288   : > { %3537 = vmatmul.msk.f32.vlgmr.msra.gmra.mxu1 %vm1832_vm3, %v4933_v7  ;;  %2008 = vmatpush.msrb.mxu2 %v3491_v29  ;;  %v1672_v29 = vld [vmem:[%s6074_s5 + $0x118] sm:$0xff] }
 0x289   : > { %2054 = vmatpush.msrb.mxu3 %v1693_v10  ;;  %3543 = vmatmul.msk.f32.vlgmr.msra.gmra.mxu0 %vm1832_vm3, %v4930_v49  ;;  %v1673_v10 = vld [vmem:[%s6074_s5 + $0x120] sm:$0xff] }
 0x28a   : > { %2094 = vmatpush.msrb.mxu1 %v1695_v11  ;;  %2154 = vmatpush.msrb.mxu0 %v1698_v30  ;;  %v1515_v11 = vadd.f32 %v1514_v26, %v4925_v0  ;;  %v1675_v30 = vld [vmem:[%s6074_s5 + $0x130] sm:$0xff]  ;;  %v1665_v0 = vld [vmem:[%s6074_s5 + $0xe0] sm:$0xff] }
 0x28b   : > { %2009 = vmatpush.msrb.mxu2 %v3483_v32  ;;  %2055 = vmatpush.msrb.mxu3 %v1685_v33  ;;  %v3589_v32 = vld [vmem:[%s6074_s5 + $0x708] sm:$0xff]  ;;  %v1628_v33 = vpop.f32.mrf.mxu1  ;;  %v3590_v26 = vld [vmem:[%s6074_s5 + $0x710] sm:$0xff] }
 0x28c   : > { %2095 = vmatpush.msrb.mxu1 %v1687_v34  ;;  %2155 = vmatpush.msrb.mxu0 %v1690_v35  ;;  %v1664_v34 = vld [vmem:[%s6074_s5 + $0xd8] sm:$0xff]  ;;  %v1574_v35 = vadd.f32 %v1570_v28, %v1515_v11  ;;  %v3585_v28 = vld [vmem:[%s6074_s5 + $0x6e8] sm:$0xff]  ;;  %v3574_v11 = vld [vmem:[%s6074_s5 + $0x690] sm:$0xff] }
 0x28d   : > { %2010 = vmatpush.msrb.mxu2 %v3475_v14  ;;  %2056 = vmatpush.msrb.mxu3 %v1677_v36  ;;  %v1667_v14 = vld [vmem:[%s6074_s5 + $0xf0] sm:$0xff]  ;;  %v3581_v36 = vld [vmem:[%s6074_s5 + $0x6c8] sm:$0xff] }
 0x28e   : > { %2096 = vmatpush.msrb.mxu1 %v1679_v57  ;;  %2156 = vmatpush.msrb.mxu0 %v1682_v15  ;;  %v1656_v57 = vld [vmem:[%s6074_s5 + $0x98] sm:$0xff]  ;;  %v1657_v15 = vld [vmem:[%s6074_s5 + $0xa0] sm:$0xff] }
 0x28f   : > { %2011 = vmatpush.msrb.mxu2 %v3467_v58  ;;  %2057 = vmatpush.msrb.mxu3 %v1669_v37  ;;  %v1632_v58 = vadd.f32 %v1628_v33, %v1574_v35  ;;  %v1659_v37 = vld [vmem:[%s6074_s5 + $0xb0] sm:$0xff]  ;;  %v3564_v33 = vld [vmem:[%s6074_s5 + $0x640] sm:$0xff]  ;;  %v1644_v35 = vld [vmem:[%s6074_s5 + $0x38] sm:$0xff] }
 0x290   : > { %2097 = vmatpush.msrb.mxu1 %v1671_v38  ;;  %2157 = vmatpush.msrb.mxu0 %v1674_v31  ;;  %v3573_v38 = vld [vmem:[%s6074_s5 + $0x688] sm:$0xff] }
 0x291   : > { %2012 = vmatpush.msrb.mxu2 %v3459_v20  ;;  %2058 = vmatpush.msrb.mxu3 %v1661_v39  ;;  %v526_v31 = vld [vmem:[%s6073_s4 + $0x8] sm:$0xff]  ;;  %v1648_v20 = vld [vmem:[%s6074_s5 + $0x58] sm:$0xff]  ;;  %v1649_v39 = vld [vmem:[%s6074_s5 + $0x60] sm:$0xff] }
 0x292   : > { %2098 = vmatpush.msrb.mxu1 %v1663_v40  ;;  %2158 = vmatpush.msrb.mxu0 %v1666_v41  ;;  %v1651_v40 = vld [vmem:[%s6074_s5 + $0x70] sm:$0xff]  ;;  %v3565_v41 = vld [vmem:[%s6074_s5 + $0x648] sm:$0xff] }
 0x293   : > { %2013 = vmatpush.msrb.mxu2 %v3451_v43  ;;  %2059 = vmatpush.msrb.mxu3 %v1653_v17  ;;  %v1640_v43 = vld [vmem:[%s6074_s5 + $0x18] sm:$0xff]  ;;  %v1641_v17 = vld [vmem:[%s6074_s5 + $0x20] sm:$0xff] }
 0x294   : > { %2099 = vmatpush.msrb.mxu1 %v1655_v18  ;;  %2159 = vmatpush.msrb.mxu0 %v1658_v19  ;;  %v1634_v18 = vadd.f32 %v1632_v58, %v526_v31  ;;  %v1643_v19 = vld [vmem:[%s6074_s5 + $0x30] sm:$0xff]  ;;  %v3648_v58 = vld [vmem:[%s6074_s5 + $0x8e0] sm:$0x3] }
 0x295   : > { %2014 = vmatpush.msrb.mxu2 %v3443_v22  ;;  %2060 = vmatpush.msrb.mxu3 %v1645_v24  ;;  %v3557_v22 = vld [vmem:[%s6074_s5 + $0x608] sm:$0xff]  ;;  %v1732_v24 = vld [vmem:[%s6074_s5 + $0x2f8] sm:$0x3]  ;;  %v3640_v31 = vld [vmem:[%s6074_s5 + $0x8a0] sm:$0xff] }
 0x296   : > { %2100 = vmatpush.msrb.mxu1 %v1647_v25  ;;  %2160 = vmatpush.msrb.mxu0 %v1650_v45  ;;  %v3644_v25 = vld [vmem:[%s6074_s5 + $0x8c0] sm:$0x3]  ;;  %v5265_v45 = vmax.f32 %v1634_v18, 0.0  ;;  %v3623_v18 = vld [vmem:[%s6074_s5 + $0x818] sm:$0xff] }
 0x297   : > { %2015 = vmatpush.msrb.mxu2 %v3435_v56  ;;  %2061 = vmatpush.msrb.mxu3 %v1637_v50  ;;  %v3646_v56 = vld [vmem:[%s6074_s5 + $0x8d0] sm:$0x3]  ;;  %v3649_v50 = vld [vmem:[%s6074_s5 + $0x8e8] sm:$0x3] }
 0x298   : > { %2101 = vmatpush.msrb.mxu1 %v1639_v60  ;;  %2161 = vmatpush.msrb.mxu0 %v1642_v51  ;;  %v1724_v60 = vld [vmem:[%s6074_s5 + $0x2b8] sm:$0xff]  ;;  %v3636_v51 = vld [vmem:[%s6074_s5 + $0x880] sm:$0xff] }
 0x299   : > { %3539 = vmatmul.msk.f32.vlgmr.msrb.gmra.mxu2 %vm1832_vm3, %v4933_v7  ;;  %3541 = vmatmul.msk.f32.vlgmr.msrb.gmra.mxu3 %vm1832_vm3, %v4930_v49  ;;  %v1705_v7 = vld [vmem:[%s6074_s5 + $0x220] sm:$0xff] }
 0x29a   : > { %3545 = vmatmul.msk.f32.vlgmr.msrb.gmra.mxu1 %vm1832_vm3, %v4930_v49  ;;  %3546 = vmatpush.msk.msra.mxu2 %vm1835_vm2, %v1728_v46  ;;  %v3638_v46 = vld [vmem:[%s6074_s5 + $0x890] sm:$0xff] }
 0x29b   : > { %3548 = vmatpush.msk.msra.mxu3 %vm1835_vm2, %v1729_v54  ;;  %3551 = vmatmul.msk.f32.vlgmr.msrb.gmra.mxu0 %vm1832_vm3, %v4930_v49  ;;  %v3641_v54 = vld [vmem:[%s6074_s5 + $0x8a8] sm:$0xff] }
 0x29c   : > { %3552 = vmatpush.msk.msra.mxu1 %vm1835_vm2, %v1731_v44  ;;  %3654 = vmatpush.msk.msra.mxu0 %vm1835_vm2, %v3645_v52  ;;  %v1716_v44 = vld [vmem:[%s6074_s5 + $0x278] sm:$0xff]  ;;  %v3628_v52 = vld [vmem:[%s6074_s5 + $0x840] sm:$0xff] }
 0x29d   : > { %2111 = vmatpush.msra.mxu2 %v1720_v62  ;;  %2131 = vmatpush.msra.mxu3 %v1721_v42  ;;  %v3630_v62 = vld [vmem:[%s6074_s5 + $0x850] sm:$0xff]  ;;  %v3633_v42 = vld [vmem:[%s6074_s5 + $0x868] sm:$0xff] }
 0x29e   : > { %2171 = vmatpush.msra.mxu1 %v1723_v4  ;;  %2355 = vmatpush.msra.mxu0 %v3637_v55  ;;  %v1708_v4 = vld [vmem:[%s6074_s5 + $0x238] sm:$0xff]  ;;  %v3620_v55 = vld [vmem:[%s6074_s5 + $0x800] sm:$0xff] }
 0x29f   : > { %2112 = vmatpush.msra.mxu2 %v1712_v53  ;;  %2132 = vmatpush.msra.mxu3 %v1713_v3  ;;  %v3622_v53 = vld [vmem:[%s6074_s5 + $0x810] sm:$0xff]  ;;  %v3625_v3 = vld [vmem:[%s6074_s5 + $0x828] sm:$0xff] }
 0x2a0   : > { %2172 = vmatpush.msra.mxu1 %v1715_v48  ;;  %2356 = vmatpush.msra.mxu0 %v3629_v63  ;;  %v1700_v48 = vld [vmem:[%s6074_s5 + $0x1f8] sm:$0xff]  ;;  %v3612_v63 = vld [vmem:[%s6074_s5 + $0x7c0] sm:$0xff] }
 0x2a1   : > { %2113 = vmatpush.msra.mxu2 %v1704_v1  ;;  %2133 = vmatpush.msra.mxu3 %v1705_v7  ;;  %v3614_v1 = vld [vmem:[%s6074_s5 + $0x7d0] sm:$0xff]  ;;  %v3617_v7 = vld [vmem:[%s6074_s5 + $0x7e8] sm:$0xff] }
 0x2a2   : > { %2173 = vmatpush.msra.mxu1 %v1707_v47  ;;  %2357 = vmatpush.msra.mxu0 %v3621_v8  ;;  %v1692_v47 = vld [vmem:[%s6074_s5 + $0x1b8] sm:$0xff]  ;;  %v3604_v8 = vld [vmem:[%s6074_s5 + $0x780] sm:$0xff] }
 0x2a3   : > { %2114 = vmatpush.msra.mxu2 %v1696_v2  ;;  %2134 = vmatpush.msra.mxu3 %v1697_v5  ;;  %v3606_v2 = vld [vmem:[%s6074_s5 + $0x790] sm:$0xff]  ;;  %v3609_v5 = vld [vmem:[%s6074_s5 + $0x7a8] sm:$0xff] }
 0x2a4   : > { %2174 = vmatpush.msra.mxu1 %v1699_v9  ;;  %2358 = vmatpush.msra.mxu0 %v3613_v59  ;;  %v1684_v9 = vld [vmem:[%s6074_s5 + $0x178] sm:$0xff]  ;;  %v3596_v59 = vld [vmem:[%s6074_s5 + $0x740] sm:$0xff] }
 0x2a5   : > { %2115 = vmatpush.msra.mxu2 %v1688_v6  ;;  %2135 = vmatpush.msra.mxu3 %v1689_v61  ;;  %v3598_v6 = vld [vmem:[%s6074_s5 + $0x750] sm:$0xff]  ;;  %v3601_v61 = vld [vmem:[%s6074_s5 + $0x768] sm:$0xff] }
 0x2a6   : > { %2175 = vmatpush.msra.mxu1 %v1691_v16  ;;  %2359 = vmatpush.msra.mxu0 %v3605_v23  ;;  %v1676_v16 = vld [vmem:[%s6074_s5 + $0x138] sm:$0xff]  ;;  %v3588_v23 = vld [vmem:[%s6074_s5 + $0x700] sm:$0xff] }
 0x2a7   : > { %2116 = vmatpush.msra.mxu2 %v1680_v12  ;;  %2136 = vmatpush.msra.mxu3 %v1681_v13  ;;  %v3593_v12 = vld [vmem:[%s6074_s5 + $0x728] sm:$0xff]  ;;  %v1668_v13 = vld [vmem:[%s6074_s5 + $0xf8] sm:$0xff] }
 0x2a8   : > { %2176 = vmatpush.msra.mxu1 %v1683_v21  ;;  %2360 = vmatpush.msra.mxu0 %v3597_v27  ;;  %v3580_v21 = vld [vmem:[%s6074_s5 + $0x6c0] sm:$0xff]  ;;  %v3582_v27 = vld [vmem:[%s6074_s5 + $0x6d0] sm:$0xff] }
 0x2a9   : > { %2117 = vmatpush.msra.mxu2 %v1672_v29  ;;  %2137 = vmatpush.msra.mxu3 %v1673_v10  ;;  %v1660_v29 = vld [vmem:[%s6074_s5 + $0xb8] sm:$0xff]  ;;  %v3572_v10 = vld [vmem:[%s6074_s5 + $0x680] sm:$0xff] }
 0x2aa   : > { %2177 = vmatpush.msra.mxu1 %v1675_v30  ;;  %2361 = vmatpush.msra.mxu0 %v3589_v32  ;;  %v3577_v30 = vld [vmem:[%s6074_s5 + $0x6a8] sm:$0xff]  ;;  %v1652_v32 = vld [vmem:[%s6074_s5 + $0x78] sm:$0xff] }
 0x2ab   : > { %2118 = vmatpush.msra.mxu2 %v1664_v34  ;;  %2138 = vmatpush.msra.mxu3 %v1665_v0  ;;  %v3566_v34 = vld [vmem:[%s6074_s5 + $0x650] sm:$0xff]  ;;  %v3569_v0 = vld [vmem:[%s6074_s5 + $0x668] sm:$0xff] }
 0x2ac   : > { %2178 = vmatpush.msra.mxu1 %v1667_v14  ;;  %2362 = vmatpush.msra.mxu0 %v3581_v36  ;;  %v3556_v14 = vld [vmem:[%s6074_s5 + $0x600] sm:$0xff]  ;;  %v3558_v36 = vld [vmem:[%s6074_s5 + $0x610] sm:$0xff] }
 0x2ad   : > { %2119 = vmatpush.msra.mxu2 %v1656_v57  ;;  %2139 = vmatpush.msra.mxu3 %v1657_v15  ;;  %v3561_v57 = vld [vmem:[%s6074_s5 + $0x628] sm:$0xff]  ;;  %v3647_v15 = vld [vmem:[%s6074_s5 + $0x8d8] sm:$0x3] }
 0x2ae   : > { %2179 = vmatpush.msra.mxu1 %v1659_v37  ;;  %2363 = vmatpush.msra.mxu0 %v3573_v38  ;;  %v3650_v37 = vld [vmem:[%s6074_s5 + $0x8f0] sm:$0x3]  ;;  %v3757_v38 = vld [vmem:[%s6074_s5 + $0xbc8] sm:$0x3] }
 0x2af   : > { %2120 = vmatpush.msra.mxu2 %v1648_v20  ;;  %2140 = vmatpush.msra.mxu3 %v1649_v39  ;;  %v3642_v20 = vld [vmem:[%s6074_s5 + $0x8b0] sm:$0xff]  ;;  %v3749_v39 = vld [vmem:[%s6074_s5 + $0xb88] sm:$0xff] }
 0x2b0   : > { %2180 = vmatpush.msra.mxu1 %v1651_v40  ;;  %2364 = vmatpush.msra.mxu0 %v3565_v41  ;;  %v3631_v40 = vld [vmem:[%s6074_s5 + $0x858] sm:$0xff]  ;;  %v3632_v41 = vld [vmem:[%s6074_s5 + $0x860] sm:$0xff] }
 0x2b1   : > { %2121 = vmatpush.msra.mxu2 %v1640_v43  ;;  %2141 = vmatpush.msra.mxu3 %v1641_v17  ;;  %v3634_v43 = vld [vmem:[%s6074_s5 + $0x870] sm:$0xff]  ;;  %v3741_v17 = vld [vmem:[%s6074_s5 + $0xb48] sm:$0xff] }
 0x2b2   : > { %2181 = vmatpush.msra.mxu1 %v1643_v19  ;;  %2365 = vmatpush.msra.mxu0 %v3557_v22  ;;  %v3624_v19 = vld [vmem:[%s6074_s5 + $0x820] sm:$0xff]  ;;  %v3626_v22 = vld [vmem:[%s6074_s5 + $0x830] sm:$0xff] }
 0x2b3   : > { %3547 = vmatmul.msk.f32.vlgmr.msra.gmra.mxu2 %vm1832_vm3, %v4930_v49  ;;  %3549 = vmatmul.msk.f32.vlgmr.msra.gmra.mxu3 %vm1832_vm3, %v4930_v49 }
 0x2b4   : > { %3553 = vmatmul.msk.f32.vlgmr.msra.gmra.mxu1 %vm1832_vm3, %v4930_v49  ;;  %3554 = vmatpush.msk.msrb.mxu2 %vm1835_vm2, %v1732_v24  ;;  %v3733_v24 = vld [vmem:[%s6074_s5 + $0xb08] sm:$0xff] }
 0x2b5   : > { %3652 = vmatpush.msk.msrb.mxu3 %vm1835_vm2, %v3644_v25  ;;  %3655 = vmatmul.msk.f32.vlgmr.msra.gmra.mxu0 %vm1832_vm3, %v5265_v45  ;;  %v3615_v25 = vld [vmem:[%s6074_s5 + $0x7d8] sm:$0xff] }
 0x2b6   : > { %3656 = vmatpush.msk.msrb.mxu1 %vm1835_vm2, %v3646_v56  ;;  %3662 = vmatpush.msk.msrb.mxu0 %vm1835_vm2, %v3649_v50  ;;  %v3616_v56 = vld [vmem:[%s6074_s5 + $0x7e0] sm:$0xff]  ;;  %v3618_v50 = vld [vmem:[%s6074_s5 + $0x7f0] sm:$0xff] }
 0x2b7   : > { %2191 = vmatpush.msrb.mxu2 %v1724_v60  ;;  %2335 = vmatpush.msrb.mxu3 %v3636_v51  ;;  %v3725_v60 = vld [vmem:[%s6074_s5 + $0xac8] sm:$0xff]  ;;  %v3607_v51 = vld [vmem:[%s6074_s5 + $0x798] sm:$0xff] }
 0x2b8   : > { %2375 = vmatpush.msrb.mxu1 %v3638_v46  ;;  %2435 = vmatpush.msrb.mxu0 %v3641_v54  ;;  %v3608_v46 = vld [vmem:[%s6074_s5 + $0x7a0] sm:$0xff]  ;;  %v3610_v54 = vld [vmem:[%s6074_s5 + $0x7b0] sm:$0xff] }
 0x2b9   : > { %2192 = vmatpush.msrb.mxu2 %v1716_v44  ;;  %2336 = vmatpush.msrb.mxu3 %v3628_v52  ;;  %v3717_v44 = vld [vmem:[%s6074_s5 + $0xa88] sm:$0xff]  ;;  %v3599_v52 = vld [vmem:[%s6074_s5 + $0x758] sm:$0xff] }
 0x2ba   : > { %2376 = vmatpush.msrb.mxu1 %v3630_v62  ;;  %2436 = vmatpush.msrb.mxu0 %v3633_v42  ;;  %v3600_v62 = vld [vmem:[%s6074_s5 + $0x760] sm:$0xff]  ;;  %v3602_v42 = vld [vmem:[%s6074_s5 + $0x770] sm:$0xff] }
 0x2bb   : > { %2193 = vmatpush.msrb.mxu2 %v1708_v4  ;;  %2337 = vmatpush.msrb.mxu3 %v3620_v55  ;;  %v3709_v4 = vld [vmem:[%s6074_s5 + $0xa48] sm:$0xff]  ;;  %v3591_v55 = vld [vmem:[%s6074_s5 + $0x718] sm:$0xff] }
 0x2bc   : > { %2377 = vmatpush.msrb.mxu1 %v3622_v53  ;;  %2437 = vmatpush.msrb.mxu0 %v3625_v3  ;;  %v3592_v53 = vld [vmem:[%s6074_s5 + $0x720] sm:$0xff]  ;;  %v3594_v3 = vld [vmem:[%s6074_s5 + $0x730] sm:$0xff] }
 0x2bd   : > { %2194 = vmatpush.msrb.mxu2 %v1700_v48  ;;  %2338 = vmatpush.msrb.mxu3 %v3612_v63  ;;  %v3701_v48 = vld [vmem:[%s6074_s5 + $0xa08] sm:$0xff]  ;;  %v3583_v63 = vld [vmem:[%s6074_s5 + $0x6d8] sm:$0xff] }
 0x2be   : > { %2378 = vmatpush.msrb.mxu1 %v3614_v1  ;;  %2438 = vmatpush.msrb.mxu0 %v3617_v7  ;;  %v3584_v1 = vld [vmem:[%s6074_s5 + $0x6e0] sm:$0xff]  ;;  %v3586_v7 = vld [vmem:[%s6074_s5 + $0x6f0] sm:$0xff] }
 0x2bf   : > { %2195 = vmatpush.msrb.mxu2 %v1692_v47  ;;  %2339 = vmatpush.msrb.mxu3 %v3604_v8  ;;  %v3693_v47 = vld [vmem:[%s6074_s5 + $0x9c8] sm:$0xff]  ;;  %v3575_v8 = vld [vmem:[%s6074_s5 + $0x698] sm:$0xff] }
 0x2c0   : > { %2379 = vmatpush.msrb.mxu1 %v3606_v2  ;;  %2439 = vmatpush.msrb.mxu0 %v3609_v5  ;;  %v3576_v2 = vld [vmem:[%s6074_s5 + $0x6a0] sm:$0xff]  ;;  %v3578_v5 = vld [vmem:[%s6074_s5 + $0x6b0] sm:$0xff] }
 0x2c1   : > { %2196 = vmatpush.msrb.mxu2 %v1684_v9  ;;  %2340 = vmatpush.msrb.mxu3 %v3596_v59  ;;  %v3685_v9 = vld [vmem:[%s6074_s5 + $0x988] sm:$0xff]  ;;  %v3567_v59 = vld [vmem:[%s6074_s5 + $0x658] sm:$0xff] }
 0x2c2   : > { %2380 = vmatpush.msrb.mxu1 %v3598_v6  ;;  %2440 = vmatpush.msrb.mxu0 %v3601_v61  ;;  %v3568_v6 = vld [vmem:[%s6074_s5 + $0x660] sm:$0xff]  ;;  %v3570_v61 = vld [vmem:[%s6074_s5 + $0x670] sm:$0xff] }
 0x2c3   : > { %2197 = vmatpush.msrb.mxu2 %v1676_v16  ;;  %2341 = vmatpush.msrb.mxu3 %v3588_v23  ;;  %v3677_v16 = vld [vmem:[%s6074_s5 + $0x948] sm:$0xff]  ;;  %v3559_v23 = vld [vmem:[%s6074_s5 + $0x618] sm:$0xff] }
 0x2c4   : > { %2381 = vmatpush.msrb.mxu1 %v3590_v26  ;;  %2441 = vmatpush.msrb.mxu0 %v3593_v12  ;;  %v3560_v26 = vld [vmem:[%s6074_s5 + $0x620] sm:$0xff]  ;;  %v3562_v12 = vld [vmem:[%s6074_s5 + $0x630] sm:$0xff] }
 0x2c5   : > { %2198 = vmatpush.msrb.mxu2 %v1668_v13  ;;  %2342 = vmatpush.msrb.mxu3 %v3580_v21  ;;  %v3669_v13 = vld [vmem:[%s6074_s5 + $0x908] sm:$0xff]  ;;  %v3651_v21 = vld [vmem:[%s6074_s5 + $0x8f8] sm:$0x3] }
 0x2c6   : > { %2382 = vmatpush.msrb.mxu1 %v3582_v27  ;;  %2442 = vmatpush.msrb.mxu0 %v3585_v28  ;;  %v3756_v27 = vld [vmem:[%s6074_s5 + $0xbc0] sm:$0x3]  ;;  %v5584_v28 = vrot.slane %v5265_v45, 4 }
 0x2c7   : > { %2199 = vmatpush.msrb.mxu2 %v1660_v29  ;;  %2343 = vmatpush.msrb.mxu3 %v3572_v10  ;;  %v3758_v29 = vld [vmem:[%s6074_s5 + $0xbd0] sm:$0x3]  ;;  %v3761_v10 = vld [vmem:[%s6074_s5 + $0xbe8] sm:$0x3] }
 0x2c8   : > { %2383 = vmatpush.msrb.mxu1 %v3574_v11  ;;  %2443 = vmatpush.msrb.mxu0 %v3577_v30  ;;  %v3643_v11 = vld [vmem:[%s6074_s5 + $0x8b8] sm:$0xff]  ;;  %v3748_v30 = vld [vmem:[%s6074_s5 + $0xb80] sm:$0xff] }
 0x2c9   : > { %2200 = vmatpush.msrb.mxu2 %v1652_v32  ;;  %2344 = vmatpush.msrb.mxu3 %v3564_v33  ;;  %v3750_v32 = vld [vmem:[%s6074_s5 + $0xb90] sm:$0xff]  ;;  %v3753_v33 = vld [vmem:[%s6074_s5 + $0xba8] sm:$0xff] }
 0x2ca   : > { %2384 = vmatpush.msrb.mxu1 %v3566_v34  ;;  %2444 = vmatpush.msrb.mxu0 %v3569_v0  ;;  %v3635_v34 = vld [vmem:[%s6074_s5 + $0x878] sm:$0xff]  ;;  %v3740_v0 = vld [vmem:[%s6074_s5 + $0xb40] sm:$0xff] }
 0x2cb   : > { %2201 = vmatpush.msrb.mxu2 %v1644_v35  ;;  %2345 = vmatpush.msrb.mxu3 %v3556_v14  ;;  %v3742_v35 = vld [vmem:[%s6074_s5 + $0xb50] sm:$0xff]  ;;  %v3745_v14 = vld [vmem:[%s6074_s5 + $0xb68] sm:$0xff] }
 0x2cc   : > { %2385 = vmatpush.msrb.mxu1 %v3558_v36  ;;  %2445 = vmatpush.msrb.mxu0 %v3561_v57  ;;  %v3627_v36 = vld [vmem:[%s6074_s5 + $0x838] sm:$0xff]  ;;  %v3732_v57 = vld [vmem:[%s6074_s5 + $0xb00] sm:$0xff] }
 0x2cd   : > { %3555 = vmatmul.msk.f32.vlgmr.msrb.gmra.mxu2 %vm1832_vm3, %v4930_v49  ;;  %3653 = vmatmul.msk.f32.vlgmr.msrb.gmra.mxu3 %vm1832_vm3, %v5265_v45  ;;  %v3639_v49 = vld [vmem:[%s6074_s5 + $0x898] sm:$0xff] }
 0x2ce   : > { %3657 = vmatmul.msk.f32.vlgmr.msrb.gmra.mxu1 %vm1832_vm3, %v5265_v45  ;;  %3658 = vmatpush.msk.msra.mxu2 %vm1835_vm2, %v3647_v15  ;;  %v3734_v15 = vld [vmem:[%s6074_s5 + $0xb10] sm:$0xff] }
 0x2cf   : > { %3660 = vmatpush.msk.msra.mxu3 %vm1835_vm2, %v3648_v58  ;;  %3663 = vmatmul.msk.f32.vlgmr.msrb.gmra.mxu0 %vm1832_vm3, %v5265_v45  ;;  %v3737_v58 = vld [vmem:[%s6074_s5 + $0xb28] sm:$0xff] }
 0x2d0   : > { %3664 = vmatpush.msk.msra.mxu1 %vm1835_vm2, %v3650_v37  ;;  %3766 = vmatpush.msk.msra.mxu0 %vm1835_vm2, %v3757_v38  ;;  %v3619_v37 = vld [vmem:[%s6074_s5 + $0x7f8] sm:$0xff]  ;;  %v3724_v38 = vld [vmem:[%s6074_s5 + $0xac0] sm:$0xff] }
 0x2d1   : > { %2395 = vmatpush.msra.mxu2 %v3639_v49  ;;  %2415 = vmatpush.msra.mxu3 %v3640_v31  ;;  %v3726_v49 = vld [vmem:[%s6074_s5 + $0xad0] sm:$0xff]  ;;  %v3729_v31 = vld [vmem:[%s6074_s5 + $0xae8] sm:$0xff] }
 0x2d2   : > { %2455 = vmatpush.msra.mxu1 %v3642_v20  ;;  %2647 = vmatpush.msra.mxu0 %v3749_v39  ;;  %v3611_v20 = vld [vmem:[%s6074_s5 + $0x7b8] sm:$0xff]  ;;  %v3716_v39 = vld [vmem:[%s6074_s5 + $0xa80] sm:$0xff] }
 0x2d3   : > { %2396 = vmatpush.msra.mxu2 %v3631_v40  ;;  %2416 = vmatpush.msra.mxu3 %v3632_v41  ;;  %v3718_v40 = vld [vmem:[%s6074_s5 + $0xa90] sm:$0xff]  ;;  %v3721_v41 = vld [vmem:[%s6074_s5 + $0xaa8] sm:$0xff] }
 0x2d4   : > { %2456 = vmatpush.msra.mxu1 %v3634_v43  ;;  %2648 = vmatpush.msra.mxu0 %v3741_v17  ;;  %v3603_v43 = vld [vmem:[%s6074_s5 + $0x778] sm:$0xff]  ;;  %v3708_v17 = vld [vmem:[%s6074_s5 + $0xa40] sm:$0xff] }
 0x2d5   : > { %2397 = vmatpush.msra.mxu2 %v3623_v18  ;;  %2417 = vmatpush.msra.mxu3 %v3624_v19  ;;  %v3710_v18 = vld [vmem:[%s6074_s5 + $0xa50] sm:$0xff]  ;;  %v3713_v19 = vld [vmem:[%s6074_s5 + $0xa68] sm:$0xff] }
 0x2d6   : > { %2457 = vmatpush.msra.mxu1 %v3626_v22  ;;  %2649 = vmatpush.msra.mxu0 %v3733_v24  ;;  %v3595_v22 = vld [vmem:[%s6074_s5 + $0x738] sm:$0xff]  ;;  %v3700_v24 = vld [vmem:[%s6074_s5 + $0xa00] sm:$0xff] }
 0x2d7   : > { %2398 = vmatpush.msra.mxu2 %v3615_v25  ;;  %2418 = vmatpush.msra.mxu3 %v3616_v56  ;;  %v3702_v25 = vld [vmem:[%s6074_s5 + $0xa10] sm:$0xff]  ;;  %v3705_v56 = vld [vmem:[%s6074_s5 + $0xa28] sm:$0xff] }
 0x2d8   : > { %2458 = vmatpush.msra.mxu1 %v3618_v50  ;;  %2650 = vmatpush.msra.mxu0 %v3725_v60  ;;  %v3587_v50 = vld [vmem:[%s6074_s5 + $0x6f8] sm:$0xff]  ;;  %v3692_v60 = vld [vmem:[%s6074_s5 + $0x9c0] sm:$0xff] }
 0x2d9   : > { %2399 = vmatpush.msra.mxu2 %v3607_v51  ;;  %2419 = vmatpush.msra.mxu3 %v3608_v46  ;;  %v3694_v51 = vld [vmem:[%s6074_s5 + $0x9d0] sm:$0xff]  ;;  %v3697_v46 = vld [vmem:[%s6074_s5 + $0x9e8] sm:$0xff] }
 0x2da   : > { %2459 = vmatpush.msra.mxu1 %v3610_v54  ;;  %2651 = vmatpush.msra.mxu0 %v3717_v44  ;;  %v3579_v54 = vld [vmem:[%s6074_s5 + $0x6b8] sm:$0xff]  ;;  %v3684_v44 = vld [vmem:[%s6074_s5 + $0x980] sm:$0xff] }
 0x2db   : > { %2400 = vmatpush.msra.mxu2 %v3599_v52  ;;  %2420 = vmatpush.msra.mxu3 %v3600_v62  ;;  %v3686_v52 = vld [vmem:[%s6074_s5 + $0x990] sm:$0xff]  ;;  %v3689_v62 = vld [vmem:[%s6074_s5 + $0x9a8] sm:$0xff] }
 0x2dc   : > { %2460 = vmatpush.msra.mxu1 %v3602_v42  ;;  %2652 = vmatpush.msra.mxu0 %v3709_v4  ;;  %v3571_v42 = vld [vmem:[%s6074_s5 + $0x678] sm:$0xff]  ;;  %v3676_v4 = vld [vmem:[%s6074_s5 + $0x940] sm:$0xff] }
 0x2dd   : > { %2401 = vmatpush.msra.mxu2 %v3591_v55  ;;  %2421 = vmatpush.msra.mxu3 %v3592_v53  ;;  %v3678_v55 = vld [vmem:[%s6074_s5 + $0x950] sm:$0xff]  ;;  %v3681_v53 = vld [vmem:[%s6074_s5 + $0x968] sm:$0xff] }
 0x2de   : > { %2461 = vmatpush.msra.mxu1 %v3594_v3  ;;  %2653 = vmatpush.msra.mxu0 %v3701_v48  ;;  %v3563_v3 = vld [vmem:[%s6074_s5 + $0x638] sm:$0xff]  ;;  %v3668_v48 = vld [vmem:[%s6074_s5 + $0x900] sm:$0xff] }
 0x2df   : > { %2402 = vmatpush.msra.mxu2 %v3583_v63  ;;  %2422 = vmatpush.msra.mxu3 %v3584_v1  ;;  %v3670_v63 = vld [vmem:[%s6074_s5 + $0x910] sm:$0xff]  ;;  %v3673_v1 = vld [vmem:[%s6074_s5 + $0x928] sm:$0xff] }
 0x2e0   : > { %2462 = vmatpush.msra.mxu1 %v3586_v7  ;;  %2654 = vmatpush.msra.mxu0 %v3693_v47  ;;  %v3759_v7 = vld [vmem:[%s6074_s5 + $0xbd8] sm:$0x3]  ;;  %v3760_v47 = vld [vmem:[%s6074_s5 + $0xbe0] sm:$0x3] }
 0x2e1   : > { %2403 = vmatpush.msra.mxu2 %v3575_v8  ;;  %2423 = vmatpush.msra.mxu3 %v3576_v2  ;;  %v3762_v8 = vld [vmem:[%s6074_s5 + $0xbf0] sm:$0x3]  ;;  %v3751_v2 = vld [vmem:[%s6074_s5 + $0xb98] sm:$0xff] }
 0x2e2   : > { %2463 = vmatpush.msra.mxu1 %v3578_v5  ;;  %2655 = vmatpush.msra.mxu0 %v3685_v9  ;;  %v3754_v5 = vld [vmem:[%s6074_s5 + $0xbb0] sm:$0xff]  ;;  %v3743_v9 = vld [vmem:[%s6074_s5 + $0xb58] sm:$0xff] }
 0x2e3   : > { %2404 = vmatpush.msra.mxu2 %v3567_v59  ;;  %2424 = vmatpush.msra.mxu3 %v3568_v6  ;;  %v3744_v59 = vld [vmem:[%s6074_s5 + $0xb60] sm:$0xff]  ;;  %v3746_v6 = vld [vmem:[%s6074_s5 + $0xb70] sm:$0xff] }
 0x2e4   : > { %2464 = vmatpush.msra.mxu1 %v3570_v61  ;;  %2656 = vmatpush.msra.mxu0 %v3677_v16  ;;  %v3735_v61 = vld [vmem:[%s6074_s5 + $0xb18] sm:$0xff]  ;;  %v3736_v16 = vld [vmem:[%s6074_s5 + $0xb20] sm:$0xff] }
 0x2e5   : > { %2405 = vmatpush.msra.mxu2 %v3559_v23  ;;  %2425 = vmatpush.msra.mxu3 %v3560_v26  ;;  %v3738_v23 = vld [vmem:[%s6074_s5 + $0xb30] sm:$0xff]  ;;  %v3727_v26 = vld [vmem:[%s6074_s5 + $0xad8] sm:$0xff] }
 0x2e6   : > { %2465 = vmatpush.msra.mxu1 %v3562_v12  ;;  %2657 = vmatpush.msra.mxu0 %v3669_v13  ;;  %v3728_v12 = vld [vmem:[%s6074_s5 + $0xae0] sm:$0xff]  ;;  %v3730_v13 = vld [vmem:[%s6074_s5 + $0xaf0] sm:$0xff] }
 0x2e7   : > { %3659 = vmatmul.msk.f32.vlgmr.msra.gmra.mxu2 %vm1832_vm3, %v5265_v45  ;;  %3661 = vmatmul.msk.f32.vlgmr.msra.gmra.mxu3 %vm1832_vm3, %v5265_v45 }
 0x2e8   : > { %3665 = vmatmul.msk.f32.vlgmr.msra.gmra.mxu1 %vm1832_vm3, %v5265_v45  ;;  %3666 = vmatpush.msk.msrb.mxu2 %vm1835_vm2, %v3651_v21  ;;  %v3719_v21 = vld [vmem:[%s6074_s5 + $0xa98] sm:$0xff] }
 0x2e9   : > { %3764 = vmatpush.msk.msrb.mxu3 %vm1835_vm2, %v3756_v27  ;;  %3767 = vmatmul.msk.f32.vlgmr.msra.gmra.mxu0 %vm1832_vm3, %v5584_v28  ;;  %v3720_v27 = vld [vmem:[%s6074_s5 + $0xaa0] sm:$0xff] }
 0x2ea   : > { %3768 = vmatpush.msk.msrb.mxu1 %vm1835_vm2, %v3758_v29  ;;  %3774 = vmatpush.msk.msrb.mxu0 %vm1835_vm2, %v3761_v10  ;;  %v3722_v29 = vld [vmem:[%s6074_s5 + $0xab0] sm:$0xff]  ;;  %v3711_v10 = vld [vmem:[%s6074_s5 + $0xa58] sm:$0xff] }
 0x2eb   : > { %2475 = vmatpush.msrb.mxu2 %v3643_v11  ;;  %2627 = vmatpush.msrb.mxu3 %v3748_v30  ;;  %v3712_v11 = vld [vmem:[%s6074_s5 + $0xa60] sm:$0xff]  ;;  %v3714_v30 = vld [vmem:[%s6074_s5 + $0xa70] sm:$0xff] }
 0x2ec   : > { %2667 = vmatpush.msrb.mxu1 %v3750_v32  ;;  %2727 = vmatpush.msrb.mxu0 %v3753_v33  ;;  %v3703_v32 = vld [vmem:[%s6074_s5 + $0xa18] sm:$0xff]  ;;  %v3704_v33 = vld [vmem:[%s6074_s5 + $0xa20] sm:$0xff] }
 0x2ed   : > { %2476 = vmatpush.msrb.mxu2 %v3635_v34  ;;  %2628 = vmatpush.msrb.mxu3 %v3740_v0  ;;  %v3706_v34 = vld [vmem:[%s6074_s5 + $0xa30] sm:$0xff]  ;;  %v3695_v0 = vld [vmem:[%s6074_s5 + $0x9d8] sm:$0xff] }
 0x2ee   : > { %2668 = vmatpush.msrb.mxu1 %v3742_v35  ;;  %2728 = vmatpush.msrb.mxu0 %v3745_v14  ;;  %v3696_v35 = vld [vmem:[%s6074_s5 + $0x9e0] sm:$0xff]  ;;  %v3698_v14 = vld [vmem:[%s6074_s5 + $0x9f0] sm:$0xff] }
 0x2ef   : > { %2477 = vmatpush.msrb.mxu2 %v3627_v36  ;;  %2629 = vmatpush.msrb.mxu3 %v3732_v57  ;;  %v3687_v36 = vld [vmem:[%s6074_s5 + $0x998] sm:$0xff]  ;;  %v3688_v57 = vld [vmem:[%s6074_s5 + $0x9a0] sm:$0xff] }
 0x2f0   : > { %2669 = vmatpush.msrb.mxu1 %v3734_v15  ;;  %2729 = vmatpush.msrb.mxu0 %v3737_v58  ;;  %v3690_v15 = vld [vmem:[%s6074_s5 + $0x9b0] sm:$0xff]  ;;  %v3679_v58 = vld [vmem:[%s6074_s5 + $0x958] sm:$0xff] }
 0x2f1   : > { %2478 = vmatpush.msrb.mxu2 %v3619_v37  ;;  %2630 = vmatpush.msrb.mxu3 %v3724_v38  ;;  %v3680_v37 = vld [vmem:[%s6074_s5 + $0x960] sm:$0xff]  ;;  %v3682_v38 = vld [vmem:[%s6074_s5 + $0x970] sm:$0xff] }
 0x2f2   : > { %2670 = vmatpush.msrb.mxu1 %v3726_v49  ;;  %2730 = vmatpush.msrb.mxu0 %v3729_v31  ;;  %v3671_v49 = vld [vmem:[%s6074_s5 + $0x918] sm:$0xff]  ;;  %v3672_v31 = vld [vmem:[%s6074_s5 + $0x920] sm:$0xff] }
 0x2f3   : > { %2479 = vmatpush.msrb.mxu2 %v3611_v20  ;;  %2631 = vmatpush.msrb.mxu3 %v3716_v39  ;;  %v3674_v20 = vld [vmem:[%s6074_s5 + $0x930] sm:$0xff]  ;;  %v3763_v39 = vld [vmem:[%s6074_s5 + $0xbf8] sm:$0x3] }
 0x2f4   : > { %2671 = vmatpush.msrb.mxu1 %v3718_v40  ;;  %2731 = vmatpush.msrb.mxu0 %v3721_v41  ;;  %v3755_v40 = vld [vmem:[%s6074_s5 + $0xbb8] sm:$0xff] }
 0x2f5   : > { %2480 = vmatpush.msrb.mxu2 %v3603_v43  ;;  %2632 = vmatpush.msrb.mxu3 %v3708_v17  ;;  %v3747_v41 = vld [vmem:[%s6074_s5 + $0xb78] sm:$0xff] }
 0x2f6   : > { %2672 = vmatpush.msrb.mxu1 %v3710_v18  ;;  %2732 = vmatpush.msrb.mxu0 %v3713_v19  ;;  %v3739_v43 = vld [vmem:[%s6074_s5 + $0xb38] sm:$0xff] }
 0x2f7   : > { %2481 = vmatpush.msrb.mxu2 %v3595_v22  ;;  %2633 = vmatpush.msrb.mxu3 %v3700_v24  ;;  %v3731_v17 = vld [vmem:[%s6074_s5 + $0xaf8] sm:$0xff] }
 0x2f8   : > { %2673 = vmatpush.msrb.mxu1 %v3702_v25  ;;  %2733 = vmatpush.msrb.mxu0 %v3705_v56  ;;  %v3723_v18 = vld [vmem:[%s6074_s5 + $0xab8] sm:$0xff] }
 0x2f9   : > { %2482 = vmatpush.msrb.mxu2 %v3587_v50  ;;  %2634 = vmatpush.msrb.mxu3 %v3692_v60  ;;  %v3715_v19 = vld [vmem:[%s6074_s5 + $0xa78] sm:$0xff] }
 0x2fa   : > { %2674 = vmatpush.msrb.mxu1 %v3694_v51  ;;  %2734 = vmatpush.msrb.mxu0 %v3697_v46  ;;  %v3707_v22 = vld [vmem:[%s6074_s5 + $0xa38] sm:$0xff] }
 0x2fb   : > { %2483 = vmatpush.msrb.mxu2 %v3579_v54  ;;  %2635 = vmatpush.msrb.mxu3 %v3684_v44  ;;  %v3699_v24 = vld [vmem:[%s6074_s5 + $0x9f8] sm:$0xff]  ;;  %v1917_v60 = vpop.f32.mrf.mxu1  ;;  %v5896_v46 = vpop.f32.mrf.mxu0 }
 0x2fc   : > { %2675 = vmatpush.msrb.mxu1 %v3686_v52  ;;  %2735 = vmatpush.msrb.mxu0 %v3689_v62  ;;  %v3691_v25 = vld [vmem:[%s6074_s5 + $0x9b8] sm:$0xff] }
 0x2fd   : > { %2484 = vmatpush.msrb.mxu2 %v3571_v42  ;;  %2636 = vmatpush.msrb.mxu3 %v3676_v4  ;;  %v3683_v56 = vld [vmem:[%s6074_s5 + $0x978] sm:$0xff] }
 0x2fe   : > { %2676 = vmatpush.msrb.mxu1 %v3678_v55  ;;  %2736 = vmatpush.msrb.mxu0 %v3681_v53  ;;  %v3675_v50 = vld [vmem:[%s6074_s5 + $0x938] sm:$0xff] }
 0x2ff   : > { %2485 = vmatpush.msrb.mxu2 %v3563_v3  ;;  %2637 = vmatpush.msrb.mxu3 %v3668_v48 }
 0x300   : > { %2677 = vmatpush.msrb.mxu1 %v3670_v63  ;;  %2737 = vmatpush.msrb.mxu0 %v3673_v1  ;;  %v1897_v51 = vpop.f32.mrf.mxu3  ;;  %v1877_v42 = vpop.f32.mrf.mxu2 }
 0x301   : > { %3667 = vmatmul.msk.f32.vlgmr.msrb.gmra.mxu2 %vm1832_vm3, %v5265_v45  ;;  %3765 = vmatmul.msk.f32.vlgmr.msrb.gmra.mxu3 %vm1832_vm3, %v5584_v28  ;;  %v3752_v45 = vld [vmem:[%s6074_s5 + $0xba0] sm:$0xff] }
 0x302   : > { %3769 = vmatmul.msk.f32.vlgmr.msrb.gmra.mxu1 %vm1832_vm3, %v5584_v28  ;;  %3770 = vmatpush.msk.msra.mxu2 %vm1835_vm2, %v3759_v7 }
 0x303   : > { %3772 = vmatpush.msk.msra.mxu3 %vm1835_vm2, %v3760_v47  ;;  %3775 = vmatmul.msk.f32.vlgmr.msrb.gmra.mxu0 %vm1832_vm3, %v5584_v28 }
 0x304   : > { %3776 = vmatpush.msk.msra.mxu1 %vm1835_vm2, %v3762_v8  ;;  %2687 = vmatpush.msra.mxu2 %v3751_v2 }
 0x305   : > { %2707 = vmatpush.msra.mxu3 %v3752_v45  ;;  %v5898_v54 = vpop.f32.mrf.mxu1 }
 0x306   : > { %2747 = vmatpush.msra.mxu1 %v3754_v5  ;;  %2688 = vmatpush.msra.mxu2 %v3743_v9  ;;  %v2083_v52 = vpop.f32.mrf.mxu0 }
 0x307   : > { %2708 = vmatpush.msra.mxu3 %v3744_v59  ;;  %v2084_v9 = vadd.f32 %v2083_v52, %v1897_v51  ;;  %v2843_v52 = vld [vmem:[%s6076_s7 + $0xa8] sm:$0xff] }
 0x308   : > { %2748 = vmatpush.msra.mxu1 %v3746_v6  ;;  %2689 = vmatpush.msra.mxu2 %v3735_v61 }
 0x309   : > { %2709 = vmatpush.msra.mxu3 %v3736_v16 }
 0x30a   : > { %2749 = vmatpush.msra.mxu1 %v3738_v23  ;;  %2690 = vmatpush.msra.mxu2 %v3727_v26  ;;  %v5900_v44 = vpop.f32.mrf.mxu3  ;;  %v1937_v3 = vpop.f32.mrf.mxu2 }
 0x30b   : > { %2710 = vmatpush.msra.mxu3 %v3728_v12 }
 0x30c   : > { %2750 = vmatpush.msra.mxu1 %v3730_v13  ;;  %2691 = vmatpush.msra.mxu2 %v3719_v21 }
 0x30d   : > { %2711 = vmatpush.msra.mxu3 %v3720_v27 }
 0x30e   : > { %2751 = vmatpush.msra.mxu1 %v3722_v29  ;;  %2692 = vmatpush.msra.mxu2 %v3711_v10 }
 0x30f   : > { %2712 = vmatpush.msra.mxu3 %v3712_v11 }
 0x310   : > { %2752 = vmatpush.msra.mxu1 %v3714_v30  ;;  %2693 = vmatpush.msra.mxu2 %v3703_v32  ;;  %v2837_v30 = vld [vmem:[%s6076_s7 + $0x78] sm:$0xff] }
 0x311   : > { %2713 = vmatpush.msra.mxu3 %v3704_v33  ;;  %v2853_v32 = vld [vmem:[%s6076_s7 + $0xf8] sm:$0xff]  ;;  %v2836_v33 = vld [vmem:[%s6076_s7 + $0x70] sm:$0xff] }
 0x312   : > { %2753 = vmatpush.msra.mxu1 %v3706_v34  ;;  %2694 = vmatpush.msra.mxu2 %v3695_v0  ;;  %v2852_v34 = vld [vmem:[%s6076_s7 + $0xf0] sm:$0xff]  ;;  %v2835_v0 = vld [vmem:[%s6076_s7 + $0x68] sm:$0xff] }
 0x313   : > { %2714 = vmatpush.msra.mxu3 %v3696_v35  ;;  %2880 = vmatpush.msra.mxu0 %v2853_v32  ;;  %v2851_v35 = vld [vmem:[%s6076_s7 + $0xe8] sm:$0xff] }
 0x314   : > { %2754 = vmatpush.msra.mxu1 %v3698_v14  ;;  %2695 = vmatpush.msra.mxu2 %v3687_v36  ;;  %v2834_v14 = vld [vmem:[%s6076_s7 + $0x60] sm:$0xff] }
 0x315   : > { %2715 = vmatpush.msra.mxu3 %v3688_v57  ;;  %2881 = vmatpush.msra.mxu0 %v2852_v34  ;;  %v2850_v36 = vld [vmem:[%s6076_s7 + $0xe0] sm:$0xff] }
 0x316   : > { %2755 = vmatpush.msra.mxu1 %v3690_v15  ;;  %2696 = vmatpush.msra.mxu2 %v3679_v58  ;;  %v2833_v15 = vld [vmem:[%s6076_s7 + $0x58] sm:$0xff] }
 0x317   : > { %2716 = vmatpush.msra.mxu3 %v3680_v37  ;;  %v2103_v62 = vpop.f32.mrf.mxu1  ;;  %2882 = vmatpush.msra.mxu0 %v2851_v35  ;;  %v2849_v58 = vld [vmem:[%s6076_s7 + $0xd8] sm:$0xff] }
 0x318   : > { %2756 = vmatpush.msra.mxu1 %v3682_v38  ;;  %2697 = vmatpush.msra.mxu2 %v3671_v49  ;;  %v5902_v55 = vpop.f32.mrf.mxu0  ;;  %v2104_v2 = vadd.f32 %v2103_v62, %v1917_v60  ;;  %v2832_v38 = vld [vmem:[%s6076_s7 + $0x50] sm:$0xff] }
 0x319   : > { %2717 = vmatpush.msra.mxu3 %v3672_v31  ;;  %3771 = vmatmul.msk.f32.vlgmr.msra.gmra.mxu2 %vm1832_vm3, %v5584_v28  ;;  %v2848_v49 = vld [vmem:[%s6076_s7 + $0xd0] sm:$0xff]  ;;  %v2831_v31 = vld [vmem:[%s6076_s7 + $0x48] sm:$0xff] }
 0x31a   : > { %2757 = vmatpush.msra.mxu1 %v3674_v20  ;;  %3773 = vmatmul.msk.f32.vlgmr.msra.gmra.mxu3 %vm1832_vm3, %v5584_v28  ;;  %v2847_v20 = vld [vmem:[%s6076_s7 + $0xc8] sm:$0xff] }
 0x31b   : > { %3777 = vmatmul.msk.f32.vlgmr.msra.gmra.mxu1 %vm1832_vm3, %v5584_v28  ;;  %3778 = vmatpush.msk.msrb.mxu2 %vm1835_vm2, %v3763_v39  ;;  %v2830_v39 = vld [vmem:[%s6076_s7 + $0x40] sm:$0xff] }
 0x31c   : > { %v2063_v4 = vpop.f32.mrf.mxu3  ;;  %v5908_v1 = vpop.f32.mrf.mxu2  ;;  %2860 = vmatpush.msrb.mxu3 %v2837_v30  ;;  %2883 = vmatpush.msra.mxu0 %v2850_v36 }
 0x31d   : > { %2767 = vmatpush.msrb.mxu2 %v3755_v40  ;;  %v2064_v26 = vadd.f32 %v2063_v4, %v1877_v42  ;;  %v2846_v40 = vld [vmem:[%s6076_s7 + $0xc0] sm:$0xff] }
 0x31e   : > { %2861 = vmatpush.msrb.mxu3 %v2836_v33  ;;  %2884 = vmatpush.msra.mxu0 %v2849_v58  ;;  %v2826_v42 = vld [vmem:[%s6076_s7 + $0x20] sm:$0xff] }
 0x31f   : > { %2768 = vmatpush.msrb.mxu2 %v3747_v41  ;;  %v2842_v4 = vld [vmem:[%s6076_s7 + $0xa0] sm:$0xff] }
 0x320   : > { %2862 = vmatpush.msrb.mxu3 %v2835_v0  ;;  %2885 = vmatpush.msra.mxu0 %v2848_v49 }
 0x321   : > { %2769 = vmatpush.msrb.mxu2 %v3739_v43  ;;  %v2829_v43 = vld [vmem:[%s6076_s7 + $0x38] sm:$0xff] }
 0x322   : > { %2863 = vmatpush.msrb.mxu3 %v2834_v14  ;;  %2886 = vmatpush.msra.mxu0 %v2847_v20 }
 0x323   : > { %2770 = vmatpush.msrb.mxu2 %v3731_v17  ;;  %v2845_v17 = vld [vmem:[%s6076_s7 + $0xb8] sm:$0xff] }
 0x324   : > { %2864 = vmatpush.msrb.mxu3 %v2833_v15  ;;  %2887 = vmatpush.msra.mxu0 %v2846_v40 }
 0x325   : > { %2771 = vmatpush.msrb.mxu2 %v3723_v18 }
 0x326   : > { %2865 = vmatpush.msrb.mxu3 %v2832_v38  ;;  %2888 = vmatpush.msra.mxu0 %v2845_v17 }
 0x327   : > { %2772 = vmatpush.msrb.mxu2 %v3715_v19 }
 0x328   : > { %2866 = vmatpush.msrb.mxu3 %v2831_v31 }
 0x329   : > { %2773 = vmatpush.msrb.mxu2 %v3707_v22 }
 0x32a   : > { %2867 = vmatpush.msrb.mxu3 %v2830_v39 }
 0x32b   : > { %2774 = vmatpush.msrb.mxu2 %v3699_v24 }
 0x32c   : > { %2868 = vmatpush.msrb.mxu3 %v2829_v43 }
 0x32d   : > { %2775 = vmatpush.msrb.mxu2 %v3691_v25  ;;  %v2828_v25 = vld [vmem:[%s6076_s7 + $0x30] sm:$0xff] }
 0x32e   : > { %2869 = vmatpush.msrb.mxu3 %v2828_v25 }
 0x32f   : > { %2776 = vmatpush.msrb.mxu2 %v3683_v56  ;;  %v2844_v56 = vld [vmem:[%s6076_s7 + $0xb0] sm:$0xff] }
 0x330   : > { %2889 = vmatpush.msra.mxu0 %v2844_v56 }
 0x331   : > { %2777 = vmatpush.msrb.mxu2 %v3675_v50  ;;  %v5904_v53 = vpop.f32.mrf.mxu1  ;;  %v2827_v50 = vld [vmem:[%s6076_s7 + $0x28] sm:$0xff] }
 0x332   : > { %3779 = vmatmul.msk.f32.vlgmr.msrb.gmra.mxu2 %vm1832_vm3, %v5584_v28  ;;  %v2367_v28 = vpop.f32.mrf.mxu0  ;;  %v2184_v18 = vadd.f32 %v5904_v53, %v5898_v54  ;;  %2870 = vmatpush.msrb.mxu3 %v2827_v50 }
 0x333   : > { %v2491_v61 = vadd.f32 %v2367_v28, %v2084_v9  ;;  %2890 = vmatpush.msra.mxu0 %v2843_v52 }
 0x334   : > { %2871 = vmatpush.msrb.mxu3 %v2826_v42 }
 0x335   : > { %2891 = vmatpush.msra.mxu0 %v2842_v4 }
 0x336   : > { %v5906_v48 = vpop.f32.mrf.mxu3  ;;  %v2123_v45 = vpop.f32.mrf.mxu2 }
 0x337   : > { %v2124_v41 = vadd.f32 %v2123_v45, %v1937_v3  ;;  %v2144_v60 = vadd.f32 %v5906_v48, %v5900_v44  ;;  %v2825_v3 = vld [vmem:[%s6076_s7 + $0x18] sm:$0xff]  ;;  %v2839_v45 = vld [vmem:[%s6076_s7 + $0x88] sm:$0xff] }
 0x338   : > { %v2841_v48 = vld [vmem:[%s6076_s7 + $0x98] sm:$0xff]  ;;  %2872 = vmatpush.msrb.mxu3 %v2825_v3 }
 0x339   : > { %2892 = vmatpush.msra.mxu0 %v2841_v48 }
 0x34b   : > { %v2387_v63 = vpop.f32.mrf.mxu1 }
 0x34c   : > { %v5910_v47 = vpop.f32.mrf.mxu0  ;;  %v2492_v59 = vadd.f32 %v2387_v63, %v2104_v2  ;;  %v2824_v63 = vld [vmem:[%s6076_s7 + $0x10] sm:$0xff]  ;;  %v2823_v2 = vld [vmem:[%s6076_s7 + $0x8] sm:$0xff] }
 0x34d   : > { %2873 = vmatpush.msrb.mxu3 %v2824_v63 }
 0x34f   : > { %2874 = vmatpush.msrb.mxu3 %v2823_v2 }
 0x350   : > { %v2347_v7 = vpop.f32.mrf.mxu3  ;;  %v5916_v21 = vpop.f32.mrf.mxu2 }
 0x351   : > { %v2490_v13 = vadd.f32 %v2347_v7, %v2064_v26  ;;  %v2840_v7 = vld [vmem:[%s6076_s7 + $0x90] sm:$0xff] }
 0x352   : > { %2893 = vmatpush.msra.mxu0 %v2840_v7 }
 0x354   : > { %2894 = vmatpush.msra.mxu0 %v2839_v45 }
 0x365   : > { %v5912_v8 = vpop.f32.mrf.mxu1 }
 0x366   : > { %v2659_v6 = vpop.f32.mrf.mxu0  ;;  %v2496_v51 = vadd.f32 %v5912_v8, %v2184_v18 }
 0x367   : > { %v2783_v12 = vadd.f32 %v2659_v6, %v2491_v61  ;;  %v2838_v6 = vld [vmem:[%s6076_s7 + $0x80] sm:$0xff]  ;;  %v2204_v61 = vadd.f32 %v5916_v21, %v5908_v1 }
 0x368   : > { %2895 = vmatpush.msra.mxu0 %v2838_v6  ;;  %v527_v1 = vld [vmem:[%s6075_s6] sm:$0x3] }
 0x369   : > { %v2792_v29 = vrot.slane %v2783_v12, 7 }
 0x36a   : > { %v5914_v5 = vpop.f32.mrf.mxu3  ;;  %v2407_v57 = vpop.f32.mrf.mxu2 }
 0x36b   : > { %v2493_v19 = vadd.f32 %v2407_v57, %v2124_v41  ;;  %v2494_v44 = vadd.f32 %v5914_v5, %v2144_v60 }
 0x37f   : > { %v2679_v16 = vpop.f32.mrf.mxu1 }
 0x380   : > { %v2784_v23 = vadd.f32 %v2679_v16, %v2492_v59  ;;  %v2822_v59 = vld [vmem:[%s6076_s7] sm:$0xff]  ;;  %v2164_v16 = vadd.f32 %v5902_v55, %v5896_v46  ;;  %v2739_v26 = vpop.f32.mrf.mxu0 }
 0x381   : > { %2875 = vmatpush.msrb.mxu3 %v2822_v59 }
 0x382   : > { %2799 = vst [vmem:[#allocation1] sm:$0xff] %v2784_v23 }
 0x384   : > { %v2639_v27 = vpop.f32.mrf.mxu3  ;;  %v5950_v37 = vpop.f32.mrf.mxu2 }
 0x385   : > { %v2782_v10 = vadd.f32 %v2639_v27, %v2490_v13  ;;  %v2497_v23 = vadd.f32 %v5950_v37, %v2204_v61  ;;  %v2495_v13 = vadd.f32 %v5910_v47, %v2164_v16  ;;  %v2854_v47 = vld [vmem:[%s6077_s8] sm:$0x1] }
 0x387   : > { %v5918_v11 = vsel %vm2793_vm4, %v2782_v10, %v2792_v29  ;;  %v2787_v29 = vadd.f32 %v2739_v26, %v2495_v13 }
 0x388   : > { %v2796_v21 = vadd.f32 %v5918_v11, %v527_v1 }
 0x398   : > { %v2759_v22 = vpop.f32.mrf.mxu1 }
 0x399   : > { %v2788_v53 = vadd.f32 %v2759_v22, %v2496_v51 }
 0x39b   : > { %v2807_v8 = vrot.slane %v2788_v53, 1 }
 0x39c   : > { %v2699_v24 = vpop.f32.mrf.mxu2 }
 0x39d   : > { %v2785_v54 = vadd.f32 %v2699_v24, %v2493_v19  ;;  %v2719_v62 = vpop.f32.mrf.mxu3 }
 0x39e   : > { %v2786_v28 = vadd.f32 %v2719_v62, %v2494_v44 }
 0x39f   : > { %2800 = vst [vmem:[#allocation1 + $0x9] sm:$0xff] %v2785_v54 }
 0x3a0   : > { %v2811_v5 = vadd.f32 %v2807_v8, %v2786_v28 }
 0x3a6   : > { %v2802_v9 = vld [vmem:[#allocation1 + $0x1] ss:$9 sm:$0xff] }
 0x3a7   : > { %2815 = vst [vmem:[#allocation1] sm:$0xff] %v2811_v5  ;;  %v2804_v46 = vadd.f32 %v2802_v9, %v2796_v21 }
 0x3b5   : > { %v2779_v12 = vpop.f32.mrf.mxu2 }
 0x3b6   : > { %v2789_v27 = vadd.f32 %v2779_v12, %v2497_v23 }
 0x3b8   : > { %v2808_v10 = vrot.slane %v2789_v27, 1 }
 0x3ba   : > { %v2812_v30 = vadd.f32 %v2808_v10, %v2787_v29 }
 0x3bc   : > { %2816 = vst [vmem:[#allocation1 + $0x9] sm:$0xff] %v2812_v30 }
 0x3c3   : > { %v2818_v55 = vld [vmem:[#allocation1 + $0x2] ss:$9 sm:$0xff] }
 0x3c4   : > { %v2820_v32 = vadd.f32 %v2818_v55, %v2804_v46 }
 0x3c6   : > { %v2821_v33 = vmax.f32 %v2820_v32, 0.0 }
 0x3c8   : > { %v2856_v34 = vperm.slane %v2821_v33, 0  ;;  %v2857_v0 = vperm.slane %v2821_v33, 1 }
 0x3ca   : > { %2876 = vmatmul.f32.vlgmr.msrb.gmra.mxu3 %v2856_v34  ;;  %2896 = vmatmul.f32.vlgmr.msra.gmra.mxu0 %v2857_v0 }
 0x447   : > { %v2897_v14 = vpop.f32.mrf.mxu0 }
 0x44d   : > { %v2877_v35 = vpop.f32.mrf.mxu3 }
 0x44e   : > { %v2878_v11 = vadd.f32 %v2877_v35, %v2854_v47 }
 0x450   : > { %v2898_v36 = vadd.f32 %v2897_v14, %v2878_v11 }
 0x452   : > { %2900 = vst [vmem:[%s324_s17] sm:$0x1] %v2898_v36 }
 0x453   : > { %4028 = shalt.err (!%p4025_p3)
}
 0x454   : > { %3899 = dma.vmem_to_hbm [thread:$0]  (%p4156_p5), %s2913_s21, 16, %s2915_s22, %s2902_s0  }
 0x455 PF: > { %p3905_p4 = scmp.ge.s32.totalorder %s4063_s12, 2  ;;  %s2926_s26 = sand.u32 1, %s4051_s30  }
 0x456   : > { %s2927_s14 = scalar_lea.sflag [#allocation3], %s2926_s26 }
 0x457   : > { %p3902_p7 = pnand %p3905_p4, %p4160_p6 }
 0x459   : > { %p3903_p8 = pneg %p3902_p7 }
 0x45b   : > { %4046 = dma.done.wait (%p3903_p8), %s2927_s14, 16  }
 0x45c   : > { %4048 = vsyncadd (%p3903_p8), %s2927_s14, 4294967280  ;;  %p19_p9 = scmp.ge.s32.totalorder %s4143_s15, 4   ;;  %s6083_s30 = smov %s4055_s10 }
 0x45d   : > { %s6084_s10 = smov %s4059_s11  ;;  %s6085_s11 = smov %s4154_s18 }
 0x45e   : > { %s6086_s12 = smov %s4143_s15  ;;  %21 = sbr.rel (!%p19_p9) target bundleno = 5 (0x5), region = 99 }
 0x463   :  { %2932 = vsyncpa [#allocation3], 1 }
 0x464   :  { %2934 = vsyncpa [#allocation3 + $0x1], 1 }

</bundles_post_ra>
